<compile_context>
chip_gen: v7x
topology: tpu7x:2x2x1
jax: 0.10.0
libtpu: 0.0.40
codegen_flags: <defaults>
</compile_context>

<pallas_src>
import functools

import jax
import jax.numpy as jnp
from jax.experimental import pallas as pl
from jax.experimental.pallas import tpu as pltpu


# ----------------------------------------------------------------------------
# Fused detection kernel over flattened rows (single grid step):
#   logits  = x @ Wcls_pad + bcls_pad           (N, CPAD)  [pad cols -> -1e30]
#   probs   = softmax(logits)                   (exact division)
#   scores  = max over foreground classes, labels = first argmax
#   bb      = sigmoid(MLP(x))                   (N, 4) cxcywh
#   packed  = (bb @ CONV8) * scale8 + score/label placed in lanes 0/1
#             -> (N, 8) = [score, label, x1*w, y1*h, x2*w, y2*h, 0, 0]
# ----------------------------------------------------------------------------
def _upt_fused_kernel(x_ref, wcls_ref, w1_ref, w2_ref, w3_ref, bias_ref,
                      conv_ref, scale_ref, out_ref, *, num_fg, cpad, d):
    x = x_ref[...]                                             # (N, D) f32

    # ---- class head: lane-dense padded logits -> softmax -> fg max/argmax ----
    logits = jnp.dot(x, wcls_ref[...], preferred_element_type=jnp.float32)
    logits = logits + bias_ref[0:1, 0:cpad]                    # pad columns -> -1e30
    m = jnp.max(logits, axis=-1, keepdims=True)
    e = jnp.exp(logits - m)                                    # pads underflow to 0
    denom = jnp.sum(e, axis=-1, keepdims=True)
    probs = e / denom                                          # exact (review note)

    idx = jax.lax.broadcasted_iota(jnp.int32, probs.shape, 1)
    probs_fg = jnp.where(idx < num_fg, probs, -1.0)            # drop no-object + pads
    max_p = jnp.max(probs_fg, axis=-1, keepdims=True)          # (N, 1)
    # first index achieving the max (matches torch .max tie semantics)
    labels_f = jnp.min(jnp.where(probs_fg >= max_p, idx, jnp.int32(2 ** 30)),
                       axis=-1, keepdims=True).astype(jnp.float32)   # (N, 1)

    # ---- bbox MLP (D -> D -> D -> 4) + sigmoid -------------------------------
    h1 = jnp.maximum(
        jnp.dot(x, w1_ref[...], preferred_element_type=jnp.float32)
        + bias_ref[1:2, 0:d], 0.0)
    h2 = jnp.maximum(
        jnp.dot(h1, w2_ref[...], preferred_element_type=jnp.float32)
        + bias_ref[2:3, 0:d], 0.0)
    bb = jax.nn.sigmoid(
        jnp.dot(h2, w3_ref[...], preferred_element_type=jnp.float32)
        + bias_ref[3:4, 0:4])                                  # (N, 4) = cx, cy, w, h

    # ---- cxcywh -> xyxy + image scaling + output packing via one matmul ------
    boxes8 = jnp.dot(bb, conv_ref[...],
                     preferred_element_type=jnp.float32) * scale_ref[...]  # (N, 8)
    col = jax.lax.broadcasted_iota(jnp.int32, boxes8.shape, 1)
    packed = (boxes8
              + jnp.where(col == 0, jnp.broadcast_to(max_p, boxes8.shape), 0.0)
              + jnp.where(col == 1, jnp.broadcast_to(labels_f, boxes8.shape), 0.0))
    out_ref[...] = packed


def prepare_upt_params(params, num_obj_classes_plus_1):
    """Pad class head to a 128-lane tile, pack all biases, build box placement."""
    w_cls = params["w_cls"]                                    # (D, C1)
    b_cls = params["b_cls"]                                    # (C1,)
    D, C1 = w_cls.shape
    assert C1 == num_obj_classes_plus_1
    CPAD = ((C1 + 127) // 128) * 128
    NEG = jnp.float32(-1e30)

    w_cls_pad = jnp.zeros((D, CPAD), jnp.float32).at[:, :C1].set(w_cls)
    b_cls_pad = jnp.full((CPAD,), NEG, jnp.float32).at[:C1].set(b_cls)

    W = max(D, CPAD)
    bias_pack = jnp.zeros((4, W), jnp.float32)
    bias_pack = bias_pack.at[0, :CPAD].set(b_cls_pad)          # class bias (+ -1e30 pads)
    bias_pack = bias_pack.at[1, :D].set(params["b1"])
    bias_pack = bias_pack.at[2, :D].set(params["b2"])
    bias_pack = bias_pack.at[3, :4].set(params["b3"])

    # (4, 8) placement matrix: cxcywh -> [0, 0, x1, y1, x2, y2, 0, 0]
    conv8 = jnp.zeros((4, 8), jnp.float32)
    conv8 = conv8.at[0, 2].set(1.0).at[0, 4].set(1.0)          # cx -> x1, x2
    conv8 = conv8.at[1, 3].set(1.0).at[1, 5].set(1.0)          # cy -> y1, y2
    conv8 = conv8.at[2, 2].set(-0.5).at[2, 4].set(0.5)         # w
    conv8 = conv8.at[3, 3].set(-0.5).at[3, 5].set(0.5)         # h

    return {
        "w_cls_pad": w_cls_pad, "w1": params["w1"], "w2": params["w2"],
        "w3": params["w3"], "bias_pack": bias_pack, "conv8": conv8,
        "cpad": CPAD, "num_fg": C1 - 1,
    }


def fused_detection(hidden_states, image_sizes, prepared):
    B, Q, D = hidden_states.shape
    N = B * Q
    CPAD = prepared["cpad"]
    W = prepared["bias_pack"].shape[1]

    # Flatten batch*query rows (layout-free: Q is a multiple of 8, D unchanged).
    x2d = hidden_states.reshape(N, D)

    # Per-row packed scale [0, 0, w, h, w, h, 0, 0]   (image_sizes rows = (h, w))
    sizes = image_sizes.astype(jnp.float32)
    h_img, w_img = sizes[:, 0], sizes[:, 1]
    zeros = jnp.zeros_like(h_img)
    scale_b = jnp.stack([zeros, zeros, w_img, h_img, w_img, h_img, zeros, zeros],
                        axis=-1)                                # (B, 8)
    scale8 = jnp.repeat(scale_b, Q, axis=0)                     # (N, 8)

    # Pad rows to a sublane multiple (no-op for the shapes here).
    NPAD = ((N + 7) // 8) * 8
    if NPAD != N:
        x2d = jnp.pad(x2d, ((0, NPAD - N), (0, 0)))
        scale8 = jnp.pad(scale8, ((0, NPAD - N), (0, 0)))

    kernel = functools.partial(_upt_fused_kernel,
                               num_fg=prepared["num_fg"], cpad=CPAD, d=D)

    packed = pl.pallas_call(
        kernel,
        grid=(1,),
        in_specs=[
            pl.BlockSpec((NPAD, D), lambda i: (0, 0)),          # flattened hidden states
            pl.BlockSpec((D, CPAD), lambda i: (0, 0)),          # padded class weight
            pl.BlockSpec((D, D), lambda i: (0, 0)),             # bbox MLP w1
            pl.BlockSpec((D, D), lambda i: (0, 0)),             # bbox MLP w2
            pl.BlockSpec((D, 4), lambda i: (0, 0)),             # bbox MLP w3
            pl.BlockSpec((4, W), lambda i: (0, 0)),             # packed biases (one DMA)
            pl.BlockSpec((4, 8), lambda i: (0, 0)),             # box placement matrix
            pl.BlockSpec((NPAD, 8), lambda i: (0, 0)),          # per-row packed scale
        ],
        out_specs=pl.BlockSpec((NPAD, 8), lambda i: (0, 0)),
        out_shape=jax.ShapeDtypeStruct((NPAD, 8), jnp.float32),
        compiler_params=pltpu.CompilerParams(
            dimension_semantics=("arbitrary",)),
    )(x2d, prepared["w_cls_pad"], prepared["w1"], prepared["w2"],
      prepared["w3"], prepared["bias_pack"], prepared["conv8"], scale8)

    packed = packed[:N].reshape(B, Q, 8)
    scores = packed[..., 0]
    labels = packed[..., 1].astype(jnp.int32)
    boxes = packed[..., 2:6]
    return scores, labels, boxes


# ----------------------------------------------------------------------------
# Pair scoring (UPT.postprocessing): pr = prior.prod(0); scores = sigmoid(lg)*pr
# Tiny (M, K) elementwise op -> plain JAX (XLA fuses it; no kernel launch).
# ----------------------------------------------------------------------------
def pair_scores(pair_logits, prior):
    pr = prior[0] * prior[1]
    return jax.nn.sigmoid(pair_logits) * pr, pr


# ----------------------------------------------------------------------------
# UPT forward (synthetic parameters; hot paths in Pallas)
# ----------------------------------------------------------------------------
def upt_forward(hidden_states, image_sizes, pair_logits, prior, prepared):
    # TODO(synk): CNN backbone + DETR encoder/decoder are external sub-modules;
    # `hidden_states` stands in for the decoder output `outputs`.
    scores, labels, boxes_xyxy = fused_detection(hidden_states, image_sizes, prepared)

    # TODO(synk): batched_nms + min/max-instance region-proposal selection is
    # data-dependent (dynamic shapes) and has no static Pallas equivalent.
    # TODO(synk): the interaction head is an external sub-module; `pair_logits`
    # and `prior` stand in for its outputs.
    pair_sc, pr = pair_scores(pair_logits, prior)
    # TODO(synk): torch.nonzero(pr) gather in UPT.postprocessing is dynamic-shape;
    # we return the dense (M, K) score grid instead.

    return {
        "pred_scores": scores,            # (B, Q)
        "pred_labels": labels,            # (B, Q) int32
        "pred_boxes": boxes_xyxy,         # (B, Q, 4) xyxy, image scale
        "pair_scores": pair_sc,           # (M, K)
        "prior_prod": pr,                 # (M, K)
    }


if __name__ == "__main__":
    key = jax.random.PRNGKey(0)
    B, Q, D = 2, 16, 256          # D=256 hard-coded in UPT (hs.view(-1, 256))
    NUM_OBJ_CLASSES = 12          # + 1 no-object
    NUM_ACTIONS = 24
    M = 8                         # human-object pairs

    keys = jax.random.split(key, 12)
    params = {
        "w_cls": jax.random.normal(keys[0], (D, NUM_OBJ_CLASSES + 1), jnp.float32) * 0.02,
        "b_cls": jnp.zeros((NUM_OBJ_CLASSES + 1,), jnp.float32),
        "w1": jax.random.normal(keys[1], (D, D), jnp.float32) * 0.02,
        "b1": jnp.zeros((D,), jnp.float32),
        "w2": jax.random.normal(keys[2], (D, D), jnp.float32) * 0.02,
        "b2": jnp.zeros((D,), jnp.float32),
        "w3": jax.random.normal(keys[3], (D, 4), jnp.float32) * 0.02,
        "b3": jnp.zeros((4,), jnp.float32),
    }
    prepared = prepare_upt_params(params, NUM_OBJ_CLASSES + 1)

    hidden_states = jax.random.normal(keys[4], (B, Q, D), jnp.float32)
    image_sizes = jnp.array([[480.0, 640.0], [512.0, 512.0]], dtype=jnp.float32)  # (h, w)
    pair_logits = jax.random.normal(keys[5], (M, NUM_ACTIONS), jnp.float32)
    prior = jax.random.uniform(keys[6], (2, M, NUM_ACTIONS), jnp.float32)

    out = upt_forward(hidden_states, image_sizes, pair_logits, prior, prepared)
    jax.block_until_ready(out)

    # ----- sanity checks against plain-JAX reference ---------------------------
    x = hidden_states.reshape(B * Q, D)
    ref_logits = (x @ params["w_cls"] + params["b_cls"]).reshape(B, Q, -1)
    ref_probs = jax.nn.softmax(ref_logits, axis=-1)[..., :-1]
    assert jnp.allclose(out["pred_scores"], ref_probs.max(-1), atol=1e-4)
    assert jnp.all(out["pred_labels"] == ref_probs.argmax(-1))

    h = jax.nn.relu(x @ params["w1"] + params["b1"])
    h = jax.nn.relu(h @ params["w2"] + params["b2"])
    bb = jax.nn.sigmoid(h @ params["w3"] + params["b3"]).reshape(B, Q, 4)
    cx, cy, w_, h_ = bb[..., 0], bb[..., 1], bb[..., 2], bb[..., 3]
    ref_xyxy = jnp.stack([cx - 0.5 * w_, cy - 0.5 * h_, cx + 0.5 * w_, cy + 0.5 * h_],
                         axis=-1)
    ref_scale = jnp.stack([image_sizes[:, 1], image_sizes[:, 0],
                           image_sizes[:, 1], image_sizes[:, 0]], axis=-1)  # (B, 4)
    ref_boxes = ref_xyxy * ref_scale[:, None, :]
    assert jnp.allclose(out["pred_boxes"], ref_boxes, atol=1e-2)

    ref_pr = prior[0] * prior[1]
    assert jnp.allclose(out["prior_prod"], ref_pr, atol=1e-6)
    assert jnp.allclose(out["pair_scores"], jax.nn.sigmoid(pair_logits) * ref_pr, atol=1e-5)

    print("KERNEL_OK")
</pallas_src>

<mosaic_0001>
module attributes {stable_mosaic.version = 11 : i64} {
  func.func @_upt_fused_kernel(%arg0: i32, %arg1: memref<32x256xf32, #tpu.memory_space<vmem>>, %arg2: memref<256x128xf32, #tpu.memory_space<vmem>>, %arg3: memref<256x256xf32, #tpu.memory_space<vmem>>, %arg4: memref<256x256xf32, #tpu.memory_space<vmem>>, %arg5: memref<256x4xf32, #tpu.memory_space<vmem>>, %arg6: memref<4x256xf32, #tpu.memory_space<vmem>>, %arg7: memref<4x8xf32, #tpu.memory_space<vmem>>, %arg8: memref<32x8xf32, #tpu.memory_space<vmem>>, %arg9: memref<32x8xf32, #tpu.memory_space<vmem>>) attributes {dimension_semantics = [#tpu.dimension_semantics<arbitrary>], iteration_bounds = array<i64: 1>, scalar_prefetch = 0 : i64, scratch_operands = 0 : i64, tpu.core_type = #tpu.core_type<tc>, window_params = [{pipeline_mode = #tpu.pipeline_mode<synchronous>, transform_indices = @transform_0, window_bounds = array<i64: 32, 256>}, {pipeline_mode = #tpu.pipeline_mode<synchronous>, transform_indices = @transform_1, window_bounds = array<i64: 256, 128>}, {pipeline_mode = #tpu.pipeline_mode<synchronous>, transform_indices = @transform_2, window_bounds = array<i64: 256, 256>}, {pipeline_mode = #tpu.pipeline_mode<synchronous>, transform_indices = @transform_3, window_bounds = array<i64: 256, 256>}, {pipeline_mode = #tpu.pipeline_mode<synchronous>, transform_indices = @transform_4, window_bounds = array<i64: 256, 4>}, {pipeline_mode = #tpu.pipeline_mode<synchronous>, transform_indices = @transform_5, window_bounds = array<i64: 4, 256>}, {pipeline_mode = #tpu.pipeline_mode<synchronous>, transform_indices = @transform_6, window_bounds = array<i64: 4, 8>}, {pipeline_mode = #tpu.pipeline_mode<synchronous>, transform_indices = @transform_7, window_bounds = array<i64: 32, 8>}, {pipeline_mode = #tpu.pipeline_mode<synchronous>, transform_indices = @transform_8, window_bounds = array<i64: 32, 8>}]} {
    %c0 = arith.constant 0 : index
    %c0_0 = arith.constant 0 : index
    %0 = vector.load %arg1[%c0, %c0_0] : memref<32x256xf32, #tpu.memory_space<vmem>>, vector<32x256xf32>
    %c0_1 = arith.constant 0 : index
    %c0_2 = arith.constant 0 : index
    %1 = vector.load %arg2[%c0_1, %c0_2] : memref<256x128xf32, #tpu.memory_space<vmem>>, vector<256x128xf32>
    %cst = arith.constant dense<0.000000e+00> : vector<32x128xf32>
    %2 = tpu.matmul %0, %1, %cst {dimension_numbers = #tpu.dot_dimension_numbers<[1], [0], [0], [1], [0, 0, 1, 1], [], []>} : vector<32x256xf32>, vector<256x128xf32>, vector<32x128xf32> -> vector<32x128xf32>
    %c0_3 = arith.constant 0 : index
    %c0_4 = arith.constant 0 : index
    %3 = vector.load %arg6[%c0_3, %c0_4] : memref<4x256xf32, #tpu.memory_space<vmem>>, vector<1x128xf32>
    %4 = vector.broadcast %3 : vector<1x128xf32> to vector<32x128xf32>
    %5 = arith.addf %2, %4 : vector<32x128xf32>
    %cst_5 = arith.constant dense<0xFF800000> : vector<32xf32>
    %6 = vector.multi_reduction <maximumf>, %5, %cst_5 [1] : vector<32x128xf32> to vector<32xf32>
    %7 = vector.shape_cast %6 : vector<32xf32> to vector<32x1xf32>
    %8 = vector.broadcast %7 : vector<32x1xf32> to vector<32x128xf32>
    %9 = arith.subf %5, %8 : vector<32x128xf32>
    %10 = math.exp %9 : vector<32x128xf32>
    %cst_6 = arith.constant dense<0.000000e+00> : vector<32xf32>
    %11 = vector.multi_reduction <add>, %10, %cst_6 [1] : vector<32x128xf32> to vector<32xf32>
    %12 = vector.shape_cast %11 : vector<32xf32> to vector<32x1xf32>
    %13 = vector.broadcast %12 : vector<32x1xf32> to vector<32x128xf32>
    %14 = arith.divf %10, %13 : vector<32x128xf32>
    %15 = tpu.iota {dimensions = array<i32: 1>} : vector<32x128xi32>
    %c12_i32 = arith.constant 12 : i32
    %16 = vector.broadcast %c12_i32 : i32 to vector<32x128xi32>
    %17 = arith.cmpi slt, %15, %16 : vector<32x128xi32>
    %cst_7 = arith.constant -1.000000e+00 : f32
    %18 = vector.broadcast %cst_7 : f32 to vector<32x128xf32>
    %19 = arith.select %17, %14, %18 : vector<32x128xi1>, vector<32x128xf32>
    %cst_8 = arith.constant dense<0xFF800000> : vector<32xf32>
    %20 = vector.multi_reduction <maximumf>, %19, %cst_8 [1] : vector<32x128xf32> to vector<32xf32>
    %21 = vector.shape_cast %20 : vector<32xf32> to vector<32x1xf32>
    %22 = vector.broadcast %21 : vector<32x1xf32> to vector<32x128xf32>
    %23 = arith.cmpf oge, %19, %22 : vector<32x128xf32>
    %c1073741824_i32 = arith.constant 1073741824 : i32
    %24 = vector.broadcast %c1073741824_i32 : i32 to vector<32x128xi32>
    %25 = arith.select %23, %15, %24 : vector<32x128xi1>, vector<32x128xi32>
    %cst_9 = arith.constant dense<2147483647> : vector<32xi32>
    %26 = vector.multi_reduction <minsi>, %25, %cst_9 [1] : vector<32x128xi32> to vector<32xi32>
    %27 = vector.shape_cast %26 : vector<32xi32> to vector<32x1xi32>
    %28 = arith.sitofp %27 : vector<32x1xi32> to vector<32x1xf32>
    %c0_10 = arith.constant 0 : index
    %c0_11 = arith.constant 0 : index
    %29 = vector.load %arg3[%c0_10, %c0_11] : memref<256x256xf32, #tpu.memory_space<vmem>>, vector<256x256xf32>
    %cst_12 = arith.constant dense<0.000000e+00> : vector<32x256xf32>
    %30 = tpu.matmul %0, %29, %cst_12 {dimension_numbers = #tpu.dot_dimension_numbers<[1], [0], [0], [1], [0, 0, 1, 1], [], []>} : vector<32x256xf32>, vector<256x256xf32>, vector<32x256xf32> -> vector<32x256xf32>
    %c1 = arith.constant 1 : index
    %c0_13 = arith.constant 0 : index
    %31 = vector.load %arg6[%c1, %c0_13] : memref<4x256xf32, #tpu.memory_space<vmem>>, vector<1x256xf32>
    %32 = vector.broadcast %31 : vector<1x256xf32> to vector<32x256xf32>
    %33 = arith.addf %30, %32 : vector<32x256xf32>
    %cst_14 = arith.constant 0.000000e+00 : f32
    %34 = vector.broadcast %cst_14 : f32 to vector<32x256xf32>
    %35 = arith.maximumf %33, %34 : vector<32x256xf32>
    %c0_15 = arith.constant 0 : index
    %c0_16 = arith.constant 0 : index
    %36 = vector.load %arg4[%c0_15, %c0_16] : memref<256x256xf32, #tpu.memory_space<vmem>>, vector<256x256xf32>
    %cst_17 = arith.constant dense<0.000000e+00> : vector<32x256xf32>
    %37 = tpu.matmul %35, %36, %cst_17 {dimension_numbers = #tpu.dot_dimension_numbers<[1], [0], [0], [1], [0, 0, 1, 1], [], []>} : vector<32x256xf32>, vector<256x256xf32>, vector<32x256xf32> -> vector<32x256xf32>
    %c2 = arith.constant 2 : index
    %c0_18 = arith.constant 0 : index
    %38 = vector.load %arg6[%c2, %c0_18] : memref<4x256xf32, #tpu.memory_space<vmem>>, vector<1x256xf32>
    %39 = vector.broadcast %38 : vector<1x256xf32> to vector<32x256xf32>
    %40 = arith.addf %37, %39 : vector<32x256xf32>
    %cst_19 = arith.constant 0.000000e+00 : f32
    %41 = vector.broadcast %cst_19 : f32 to vector<32x256xf32>
    %42 = arith.maximumf %40, %41 : vector<32x256xf32>
    %c0_20 = arith.constant 0 : index
    %c0_21 = arith.constant 0 : index
    %43 = vector.load %arg5[%c0_20, %c0_21] : memref<256x4xf32, #tpu.memory_space<vmem>>, vector<256x4xf32>
    %cst_22 = arith.constant dense<0.000000e+00> : vector<32x4xf32>
    %44 = tpu.matmul %42, %43, %cst_22 {dimension_numbers = #tpu.dot_dimension_numbers<[1], [0], [0], [1], [0, 0, 1, 1], [], []>} : vector<32x256xf32>, vector<256x4xf32>, vector<32x4xf32> -> vector<32x4xf32>
    %c3 = arith.constant 3 : index
    %c0_23 = arith.constant 0 : index
    %45 = vector.load %arg6[%c3, %c0_23] : memref<4x256xf32, #tpu.memory_space<vmem>>, vector<1x4xf32>
    %46 = vector.broadcast %45 : vector<1x4xf32> to vector<32x4xf32>
    %47 = arith.addf %44, %46 : vector<32x4xf32>
    %48 = arith.negf %47 : vector<32x4xf32>
    %49 = math.exp %48 : vector<32x4xf32>
    %cst_24 = arith.constant 1.000000e+00 : f32
    %50 = vector.broadcast %cst_24 : f32 to vector<32x4xf32>
    %51 = arith.addf %50, %49 : vector<32x4xf32>
    %52 = arith.divf %50, %51 : vector<32x4xf32>
    %c0_25 = arith.constant 0 : index
    %c0_26 = arith.constant 0 : index
    %53 = vector.load %arg7[%c0_25, %c0_26] : memref<4x8xf32, #tpu.memory_space<vmem>>, vector<4x8xf32>
    %cst_27 = arith.constant dense<0.000000e+00> : vector<32x8xf32>
    %54 = tpu.matmul %52, %53, %cst_27 {dimension_numbers = #tpu.dot_dimension_numbers<[1], [0], [0], [1], [0, 0, 1, 1], [], []>} : vector<32x4xf32>, vector<4x8xf32>, vector<32x8xf32> -> vector<32x8xf32>
    %c0_28 = arith.constant 0 : index
    %c0_29 = arith.constant 0 : index
    %55 = vector.load %arg8[%c0_28, %c0_29] : memref<32x8xf32, #tpu.memory_space<vmem>>, vector<32x8xf32>
    %56 = arith.mulf %54, %55 : vector<32x8xf32>
    %57 = tpu.iota {dimensions = array<i32: 1>} : vector<32x8xi32>
    %c0_i32 = arith.constant 0 : i32
    %58 = vector.broadcast %c0_i32 : i32 to vector<32x8xi32>
    %59 = arith.cmpi eq, %57, %58 : vector<32x8xi32>
    %60 = vector.shape_cast %21 : vector<32x1xf32> to vector<32x1xf32>
    %61 = vector.broadcast %60 : vector<32x1xf32> to vector<32x8xf32>
    %cst_30 = arith.constant 0.000000e+00 : f32
    %62 = vector.broadcast %cst_30 : f32 to vector<32x8xf32>
    %63 = arith.select %59, %61, %62 : vector<32x8xi1>, vector<32x8xf32>
    %64 = arith.addf %56, %63 : vector<32x8xf32>
    %c1_i32 = arith.constant 1 : i32
    %65 = vector.broadcast %c1_i32 : i32 to vector<32x8xi32>
    %66 = arith.cmpi eq, %57, %65 : vector<32x8xi32>
    %67 = vector.shape_cast %28 : vector<32x1xf32> to vector<32x1xf32>
    %68 = vector.broadcast %67 : vector<32x1xf32> to vector<32x8xf32>
    %cst_31 = arith.constant 0.000000e+00 : f32
    %69 = vector.broadcast %cst_31 : f32 to vector<32x8xf32>
    %70 = arith.select %66, %68, %69 : vector<32x8xi1>, vector<32x8xf32>
    %71 = arith.addf %64, %70 : vector<32x8xf32>
    %c0_32 = arith.constant 0 : index
    %c0_33 = arith.constant 0 : index
    %72 = vector.load %arg9[%c0_32, %c0_33] : memref<32x8xf32, #tpu.memory_space<vmem>>, vector<32x8xf32>
    tpu.vector_store %arg9[%c0_32, %c0_33], %71 {strides = array<i32>} : memref<32x8xf32, #tpu.memory_space<vmem>>, vector<32x8xf32>,
    return
  }
  func.func @transform_0(%arg0: i32) -> (i32, i32) {
    %c0_i32 = arith.constant 0 : i32
    %c0_i32_0 = arith.constant 0 : i32
    %c0_i32_1 = arith.constant 0 : i32
    return %c0_i32, %c0_i32_0 : i32, i32
  }
  func.func @transform_1(%arg0: i32) -> (i32, i32) {
    %c0_i32 = arith.constant 0 : i32
    %c0_i32_0 = arith.constant 0 : i32
    %c0_i32_1 = arith.constant 0 : i32
    return %c0_i32, %c0_i32_0 : i32, i32
  }
  func.func @transform_2(%arg0: i32) -> (i32, i32) {
    %c0_i32 = arith.constant 0 : i32
    %c0_i32_0 = arith.constant 0 : i32
    %c0_i32_1 = arith.constant 0 : i32
    return %c0_i32, %c0_i32_0 : i32, i32
  }
  func.func @transform_3(%arg0: i32) -> (i32, i32) {
    %c0_i32 = arith.constant 0 : i32
    %c0_i32_0 = arith.constant 0 : i32
    %c0_i32_1 = arith.constant 0 : i32
    return %c0_i32, %c0_i32_0 : i32, i32
  }
  func.func @transform_4(%arg0: i32) -> (i32, i32) {
    %c0_i32 = arith.constant 0 : i32
    %c0_i32_0 = arith.constant 0 : i32
    %c0_i32_1 = arith.constant 0 : i32
    return %c0_i32, %c0_i32_0 : i32, i32
  }
  func.func @transform_5(%arg0: i32) -> (i32, i32) {
    %c0_i32 = arith.constant 0 : i32
    %c0_i32_0 = arith.constant 0 : i32
    %c0_i32_1 = arith.constant 0 : i32
    return %c0_i32, %c0_i32_0 : i32, i32
  }
  func.func @transform_6(%arg0: i32) -> (i32, i32) {
    %c0_i32 = arith.constant 0 : i32
    %c0_i32_0 = arith.constant 0 : i32
    %c0_i32_1 = arith.constant 0 : i32
    return %c0_i32, %c0_i32_0 : i32, i32
  }
  func.func @transform_7(%arg0: i32) -> (i32, i32) {
    %c0_i32 = arith.constant 0 : i32
    %c0_i32_0 = arith.constant 0 : i32
    %c0_i32_1 = arith.constant 0 : i32
    return %c0_i32, %c0_i32_0 : i32, i32
  }
  func.func @transform_8(%arg0: i32) -> (i32, i32) {
    %c0_i32 = arith.constant 0 : i32
    %c0_i32_0 = arith.constant 0 : i32
    %c0_i32_1 = arith.constant 0 : i32
    return %c0_i32, %c0_i32_0 : i32, i32
  }
}

</mosaic_0001>

<bundles_post_ra>
// kernel: tpu_custom_call.1
= control target key start
LH: loop header
LB: loop body
LE: loop exit
PB: predicated region body
PF: predicated region fallthrough
CT: control target
= control target key end

     0   :  { %13 = vsyncpa [#allocation3], 0  ;;  %s1840_s0 = inlined_call_operand.hbm [shape: f32[32,256], index: 0, kind: input, shape index: {}]   ;;  %s1841_s1 = inlined_call_operand.vmem [shape: f32[256,128], index: 1, kind: input, shape index: {}]   ;;  %s1842_s2 = inlined_call_operand.hbm [shape: f32[256,256], index: 2, kind: input, shape index: {}]   ;;  %s1843_s3 = inlined_call_operand.hbm [shape: f32[256,256], index: 3, kind: input, shape index: {}]   ;;  %s1844_s4 = inlined_call_operand.vmem [shape: f32[256,4], index: 4, kind: input, shape index: {}]   ;;  %s1845_s5 = inlined_call_operand.vmem [shape: f32[4,256], index: 5, kind: input, shape index: {}]   ;;  %s1846_s6 = inlined_call_operand.vmem [shape: f32[4,8], index: 6, kind: input, shape index: {}]   ;;  %s1847_s7 = inlined_call_operand.vmem [shape: f32[32,8], index: 7, kind: input, shape index: {}]   ;;  %s1848_s8 = inlined_call_operand.vmem [shape: f32[32,8], index: 8, kind: output, shape index: {}]  }
   0x1   :  { %14 = vsyncpa [#allocation5], 0  ;;  %s1368_s27 = smov [#allocation4]   ;;  %s1369_s29 = smov [#allocation2]  }
   0x2   :  { %s34_s28 = sshll.u32 %s1368_s27, 4  ;;  %s20_s30 = sshll.u32 %s1369_s29, 4  ;;  %s35_s28 = int_to_ptr.vmem [resolvable:$true] %s34_s28  ;;  %s1418_s30 = int_to_ptr.vmem [resolvable:$true] %s20_s30 }
   0x3   :  { %s1298_s11 = scalar_lea.hbm %s1842_s2, 8192 }
   0x4   :  { %p1299_p0 = scmp.ne.s32.totalorder %s1842_s2, %s1298_s11  ;;  %p1302_p1 = scmp.lt.u32.totalorder %s1298_s11, %s1842_s2 }
   0x6   :  { %p1304_p2 = pnand %p1302_p1, %p1299_p0 }
   0x8   :  { %1307 = shalt.err (!%p1304_p2)
}
   0x9   :  { %s1308_s16 = scalar_lea.vmem %s35_s28, 8192  ;;  %p1313_p4 = scmp.lt.s32.totalorder %s35_s28, %s35_s28 }
   0xa   :  { %p1309_p3 = scmp.ne.s32.totalorder %s35_s28, %s1308_s16  ;;  %p1314_p5 = scmp.lt.s32.totalorder %s1308_s16, %s1308_s16 }
   0xc   :  { %p1315_p6 = por %p1314_p5, %p1313_p4 }
   0xe   :  { %p1316_p7 = pnand %p1315_p6, %p1309_p3 }
  0x10   :  { %1319 = shalt.err (!%p1316_p7)
}
  0x11   :  { %s1370_s17 = smov 256   ;;  %s1371_s18 = smov 16  }
  0x12   :  { %40 = dma.hbm_to_vmem [thread:$0]  %s1842_s2, 8192, %s35_s28, [#allocation5], %s1370_s17, %s1370_s17, %s1371_s18  }
  0x13   :  { %s1320_s23 = scalar_lea.hbm %s1840_s0, 1024 }
  0x14   :  { %p1321_p8 = scmp.ne.s32.totalorder %s1840_s0, %s1320_s23  ;;  %p1324_p9 = scmp.lt.u32.totalorder %s1320_s23, %s1840_s0 }
  0x16   :  { %p1326_p10 = pnand %p1324_p9, %p1321_p8 }
  0x18   :  { %1329 = shalt.err (!%p1326_p10)
}
  0x19   :  { %s1330_s29 = scalar_lea.vmem %s1418_s30, 1024  ;;  %p1335_p12 = scmp.lt.s32.totalorder %s1418_s30, %s1418_s30 }
  0x1a   :  { %p1331_p11 = scmp.ne.s32.totalorder %s1418_s30, %s1330_s29  ;;  %p1336_p13 = scmp.lt.s32.totalorder %s1330_s29, %s1330_s29 }
  0x1c   :  { %p1337_p0 = por %p1336_p13, %p1335_p12 }
  0x1e   :  { %p1338_p1 = pnand %p1337_p0, %p1331_p11 }
  0x20   :  { %1341 = shalt.err (!%p1338_p1)
}
  0x21   :  { %26 = dma.hbm_to_vmem [thread:$0]  %s1840_s0, 1024, %s1418_s30, [#allocation3], %s1370_s17, %s1370_s17, %s1371_s18  }
  0x22   :  { %s1372_s9 = smov [#allocation6]   ;;  %s1342_s13 = scalar_lea.hbm %s1843_s3, 8192 }
  0x23   :  { %s46_s10 = sshll.u32 %s1372_s9, 4  ;;  %p1343_p2 = scmp.ne.s32.totalorder %s1843_s3, %s1342_s13  ;;  %s47_s10 = int_to_ptr.vmem [resolvable:$true] %s46_s10 }
  0x24   :  { %p1346_p3 = scmp.lt.u32.totalorder %s1342_s13, %s1843_s3 }
  0x26   :  { %p1348_p4 = pnand %p1346_p3, %p1343_p2 }
  0x28   :  { %1351 = shalt.err (!%p1348_p4)
}
  0x29   :  { %s1352_s20 = scalar_lea.vmem %s47_s10, 8192  ;;  %p1357_p6 = scmp.lt.s32.totalorder %s47_s10, %s47_s10 }
  0x2a   :  { %p1353_p5 = scmp.ne.s32.totalorder %s47_s10, %s1352_s20  ;;  %p1358_p7 = scmp.lt.s32.totalorder %s1352_s20, %s1352_s20 }
  0x2c   :  { %p1359_p8 = por %p1358_p7, %p1357_p6 }
  0x2e   :  { %p1360_p9 = pnand %p1359_p8, %p1353_p5 }
  0x30   :  { %1363 = shalt.err (!%p1360_p9)
}
  0x31   :  { %52 = dma.hbm_to_vmem [thread:$0]  %s1843_s3, 8192, %s47_s10, [#allocation5], %s1370_s17, %s1370_s17, %s1371_s18  }
  0x32   :  { %1364 = dma.done.wait [#allocation3], 1024  }
  0x33   :  { %1365 = vsyncadd [#allocation3], 4294966272 }
  0x34   :  { %1366 = dma.done.wait [#allocation5], 16384  }
  0x35   :  { %1367 = vsyncadd [#allocation5], 4294950912  ;;  %v94_v0 = vld [vmem:[%s1841_s1 + $0x80] sm:$0xff]  ;;  %v95_v1 = vld [vmem:[%s1841_s1 + $0x88] sm:$0xff]  ;;  %vm827_vm1 = vcmask 1043456   ;;  %vm814_vm6 = vcmask 31744  }
  0x36   :  { %v320_v2 = vld [vmem:[#allocation4 + $0x8] sm:$0xff]  ;;  %v1067_v3 = vpack.c.bf16 %v95_v1, %v94_v0  ;;  %v322_v4 = vld [vmem:[#allocation4 + $0x18] sm:$0xff]  ;;  %v78_v5 = vld [vmem:[%s1841_s1] sm:$0xff]  ;;  %vm942_vm13 = vcmask 64512  }
  0x37   :  { %v79_v6 = vld [vmem:[%s1841_s1 + $0x8] sm:$0xff]  ;;  %v1099_v7 = vpack.c.bf16 %v322_v4, %v320_v2  ;;  %v319_v9 = vld [vmem:[#allocation4] sm:$0xff]  ;;  %v321_v10 = vld [vmem:[#allocation4 + $0x10] sm:$0xff] }
  0x38   :  { %v1069_v8 = vpack.c.bf16 %v79_v6, %v78_v5  ;;  %v96_v11 = vld [vmem:[%s1841_s1 + $0x90] sm:$0xff]  ;;  %1068 = vmatprep.subr.bf16.mxu0 %v1067_v3  ;;  %v1101_v12 = vpack.c.bf16 %v321_v10, %v319_v9  ;;  %v97_v13 = vld [vmem:[%s1841_s1 + $0x98] sm:$0xff]  ;;  %v324_v14 = vld [vmem:[#allocation4 + $0x28] sm:$0xff] }
  0x39   :  { %v326_v15 = vld [vmem:[#allocation4 + $0x38] sm:$0xff]  ;;  %1100 = vmatprep.subr.bf16.mxu1 %v1099_v7  ;;  %v1071_v16 = vpack.c.bf16 %v97_v13, %v96_v11  ;;  %v80_v18 = vld [vmem:[%s1841_s1 + $0x10] sm:$0xff]  ;;  %v323_v20 = vld [vmem:[#allocation4 + $0x20] sm:$0xff] }
  0x3a   :  { %1070 = vmatpush3.bf16.msra.mxu0 %v1069_v8  ;;  %v1103_v17 = vpack.c.bf16 %v326_v15, %v324_v14  ;;  %v81_v19 = vld [vmem:[%s1841_s1 + $0x18] sm:$0xff]  ;;  %1102 = vmatpush1.bf16.msra.mxu1 %v1101_v12  ;;  %v325_v22 = vld [vmem:[#allocation4 + $0x30] sm:$0xff]  ;;  %v98_v23 = vld [vmem:[%s1841_s1 + $0xa0] sm:$0xff] }
  0x3b   :  { %v1073_v21 = vpack.c.bf16 %v81_v19, %v80_v18  ;;  %v99_v24 = vld [vmem:[%s1841_s1 + $0xa8] sm:$0xff]  ;;  %1072 = vmatprep.subr.bf16.mxu0 %v1071_v16  ;;  %v1105_v25 = vpack.c.bf16 %v325_v22, %v323_v20  ;;  %v330_v28 = vld [vmem:[#allocation4 + $0x58] sm:$0xff]  ;;  %v82_v29 = vld [vmem:[%s1841_s1 + $0x20] sm:$0xff] }
  0x3c   :  { %1104 = vmatprep.subr.bf16.mxu1 %v1103_v17  ;;  %v1075_v26 = vpack.c.bf16 %v99_v24, %v98_v23  ;;  %v328_v27 = vld [vmem:[#allocation4 + $0x48] sm:$0xff]  ;;  %v327_v32 = vld [vmem:[#allocation4 + $0x40] sm:$0xff]  ;;  %v329_v33 = vld [vmem:[#allocation4 + $0x50] sm:$0xff] }
  0x3d   :  { %v1107_v30 = vpack.c.bf16 %v330_v28, %v328_v27  ;;  %v83_v31 = vld [vmem:[%s1841_s1 + $0x28] sm:$0xff]  ;;  %v100_v35 = vld [vmem:[%s1841_s1 + $0xb0] sm:$0xff]  ;;  %v101_v36 = vld [vmem:[%s1841_s1 + $0xb8] sm:$0xff]  ;;  %v1109_v38 = vpack.c.bf16 %v329_v33, %v327_v32 }
  0x3e   :  { %1074 = vmatpush3.bf16.msra.mxu0 %v1073_v21  ;;  %v1077_v34 = vpack.c.bf16 %v83_v31, %v82_v29  ;;  %v332_v37 = vld [vmem:[#allocation4 + $0x68] sm:$0xff]  ;;  %1106 = vmatpush1.bf16.msra.mxu1 %v1105_v25  ;;  %v1079_v39 = vpack.c.bf16 %v101_v36, %v100_v35  ;;  %v334_v40 = vld [vmem:[#allocation4 + $0x78] sm:$0xff]  ;;  %v84_v41 = vld [vmem:[%s1841_s1 + $0x30] sm:$0xff] }
  0x3f   :  { %1076 = vmatprep.subr.bf16.mxu0 %v1075_v26  ;;  %v85_v42 = vld [vmem:[%s1841_s1 + $0x38] sm:$0xff]  ;;  %1108 = vmatprep.subr.bf16.mxu1 %v1107_v30  ;;  %v1111_v43 = vpack.c.bf16 %v334_v40, %v332_v37  ;;  %v331_v44 = vld [vmem:[#allocation4 + $0x60] sm:$0xff]  ;;  %v333_v45 = vld [vmem:[#allocation4 + $0x70] sm:$0xff] }
  0x40   :  { %v102_v46 = vld [vmem:[%s1841_s1 + $0xc0] sm:$0xff]  ;;  %v103_v47 = vld [vmem:[%s1841_s1 + $0xc8] sm:$0xff]  ;;  %v338_v49 = vld [vmem:[#allocation4 + $0x98] sm:$0xff]  ;;  %v1081_v50 = vpack.c.bf16 %v85_v42, %v84_v41  ;;  %v1113_v51 = vpack.c.bf16 %v333_v45, %v331_v44 }
  0x41   :  { %v336_v48 = vld [vmem:[#allocation4 + $0x88] sm:$0xff]  ;;  %v1083_v52 = vpack.c.bf16 %v103_v47, %v102_v46  ;;  %v86_v53 = vld [vmem:[%s1841_s1 + $0x40] sm:$0xff]  ;;  %v337_v57 = vld [vmem:[#allocation4 + $0x90] sm:$0xff] }
  0x42   :  { %1078 = vmatpush3.bf16.msra.mxu0 %v1077_v34  ;;  %1110 = vmatpush1.bf16.msra.mxu1 %v1109_v38  ;;  %v87_v54 = vld [vmem:[%s1841_s1 + $0x48] sm:$0xff]  ;;  %v335_v55 = vld [vmem:[#allocation4 + $0x80] sm:$0xff]  ;;  %v1115_v56 = vpack.c.bf16 %v338_v49, %v336_v48  ;;  %v104_v58 = vld [vmem:[%s1841_s1 + $0xd0] sm:$0xff] }
  0x43   :  { %1080 = vmatprep.subr.bf16.mxu0 %v1079_v39  ;;  %1112 = vmatprep.subr.bf16.mxu1 %v1111_v43  ;;  %v105_v59 = vld [vmem:[%s1841_s1 + $0xd8] sm:$0xff]  ;;  %v340_v60 = vld [vmem:[#allocation4 + $0xa8] sm:$0xff]  ;;  %v1085_v62 = vpack.c.bf16 %v87_v54, %v86_v53  ;;  %v1117_v63 = vpack.c.bf16 %v337_v57, %v335_v55  ;;  %v88_v1 = vld [vmem:[%s1841_s1 + $0x50] sm:$0xff] }
  0x44   :  { %v342_v61 = vld [vmem:[#allocation4 + $0xb8] sm:$0xff]  ;;  %v1087_v0 = vpack.c.bf16 %v105_v59, %v104_v58  ;;  %v339_v3 = vld [vmem:[#allocation4 + $0xa0] sm:$0xff]  ;;  %v341_v5 = vld [vmem:[#allocation4 + $0xb0] sm:$0xff] }
  0x45   :  { %v89_v2 = vld [vmem:[%s1841_s1 + $0x58] sm:$0xff]  ;;  %v1119_v4 = vpack.c.bf16 %v342_v61, %v340_v60  ;;  %v106_v6 = vld [vmem:[%s1841_s1 + $0xe0] sm:$0xff]  ;;  %v107_v7 = vld [vmem:[%s1841_s1 + $0xe8] sm:$0xff]  ;;  %v1121_v12 = vpack.c.bf16 %v341_v5, %v339_v3 }
  0x46   :  { %1082 = vmatpush3.bf16.msra.mxu0 %v1081_v50  ;;  %1114 = vmatpush1.bf16.msra.mxu1 %v1113_v51  ;;  %v344_v8 = vld [vmem:[#allocation4 + $0xc8] sm:$0xff]  ;;  %v346_v9 = vld [vmem:[#allocation4 + $0xd8] sm:$0xff]  ;;  %v1089_v10 = vpack.c.bf16 %v89_v2, %v88_v1  ;;  %v90_v11 = vld [vmem:[%s1841_s1 + $0x60] sm:$0xff]  ;;  %v1091_v13 = vpack.c.bf16 %v107_v7, %v106_v6 }
  0x47   :  { %1084 = vmatprep.subr.bf16.mxu0 %v1083_v52  ;;  %1116 = vmatprep.subr.bf16.mxu1 %v1115_v56  ;;  %v91_v14 = vld [vmem:[%s1841_s1 + $0x68] sm:$0xff]  ;;  %v343_v15 = vld [vmem:[#allocation4 + $0xc0] sm:$0xff]  ;;  %v1123_v17 = vpack.c.bf16 %v346_v9, %v344_v8  ;;  %v345_v18 = vld [vmem:[#allocation4 + $0xd0] sm:$0xff] }
  0x48   :  { %v71_v16 = vld [vmem:[#allocation2 + $0x8] sm:$0xff]  ;;  %v108_v19 = vld [vmem:[%s1841_s1 + $0xf0] sm:$0xff]  ;;  %v109_v20 = vld [vmem:[%s1841_s1 + $0xf8] sm:$0xff]  ;;  %v1093_v23 = vpack.c.bf16 %v91_v14, %v90_v11  ;;  %v1125_v24 = vpack.c.bf16 %v345_v18, %v343_v15 }
  0x49   :  { %179 = vmatprep.mubr.f32.mxu0 %v71_v16  ;;  %v348_v21 = vld [vmem:[#allocation4 + $0xe8] sm:$0xff]  ;;  %v350_v22 = vld [vmem:[#allocation4 + $0xf8] sm:$0xff]  ;;  %460 = vmatprep.mubr.f32.mxu1 %v71_v16  ;;  %v1095_v25 = vpack.c.bf16 %v109_v20, %v108_v19  ;;  %v92_v26 = vld [vmem:[%s1841_s1 + $0x70] sm:$0xff] }
  0x4a   :  { %1086 = vmatpush3.bf16.msra.mxu0 %v1085_v62  ;;  %1118 = vmatpush1.bf16.msra.mxu1 %v1117_v63  ;;  %v93_v27 = vld [vmem:[%s1841_s1 + $0x78] sm:$0xff]  ;;  %v1127_v28 = vpack.c.bf16 %v350_v22, %v348_v21  ;;  %v347_v29 = vld [vmem:[#allocation4 + $0xe0] sm:$0xff]  ;;  %v349_v30 = vld [vmem:[#allocation4 + $0xf0] sm:$0xff] }
  0x4b   :  { %1088 = vmatprep.subr.bf16.mxu0 %v1087_v0  ;;  %1120 = vmatprep.subr.bf16.mxu1 %v1119_v4  ;;  %v352_v31 = vld [vmem:[#allocation4 + $0x108] sm:$0xff]  ;;  %v354_v32 = vld [vmem:[#allocation4 + $0x118] sm:$0xff]  ;;  %v1097_v33 = vpack.c.bf16 %v93_v27, %v92_v26  ;;  %v1129_v34 = vpack.c.bf16 %v349_v30, %v347_v29  ;;  %v351_v36 = vld [vmem:[#allocation4 + $0x100] sm:$0xff] }
  0x4c   :  { %v1131_v35 = vpack.c.bf16 %v354_v32, %v352_v31  ;;  %v353_v37 = vld [vmem:[#allocation4 + $0x110] sm:$0xff]  ;;  %v356_v38 = vld [vmem:[#allocation4 + $0x128] sm:$0xff]  ;;  %v358_v39 = vld [vmem:[#allocation4 + $0x138] sm:$0xff] }
  0x4d   :  { %v1566_v40 = vld [vmem:[#allocation2] sm:$0xff]  ;;  %v1133_v41 = vpack.c.bf16 %v353_v37, %v351_v36  ;;  %v1568_v42 = vld [vmem:[#allocation2 + $0x18] sm:$0xff]  ;;  %v357_v44 = vld [vmem:[#allocation4 + $0x130] sm:$0xff]  ;;  %v1135_v46 = vpack.c.bf16 %v358_v39, %v356_v38 }
  0x4e   :  { %1090 = vmatpush3.bf16.msra.mxu0 %v1089_v10  ;;  %1122 = vmatpush1.bf16.msra.mxu1 %v1121_v12  ;;  %v355_v43 = vld [vmem:[#allocation4 + $0x120] sm:$0xff]  ;;  %v1570_v45 = vld [vmem:[#allocation2 + $0x10] sm:$0xff]  ;;  %v360_v47 = vld [vmem:[#allocation4 + $0x148] sm:$0xff] }
  0x4f   :  { %1092 = vmatprep.subr.bf16.mxu0 %v1091_v13  ;;  %1124 = vmatprep.subr.bf16.mxu1 %v1123_v17  ;;  %v362_v48 = vld [vmem:[#allocation4 + $0x158] sm:$0xff]  ;;  %v494_v49 = vld [vmem:[#allocation6 + $0x8] sm:$0xff]  ;;  %v493_v51 = vld [vmem:[#allocation6] sm:$0xff]  ;;  %v1137_v58 = vpack.c.bf16 %v357_v44, %v355_v43 }
  0x50   :  { %v496_v50 = vld [vmem:[#allocation6 + $0x18] sm:$0xff]  ;;  %v495_v52 = vld [vmem:[#allocation6 + $0x10] sm:$0xff]  ;;  %v1574_v53 = vld [vmem:[#allocation2 + $0x28] sm:$0xff]  ;;  %v1139_v63 = vpack.c.bf16 %v362_v48, %v360_v47 }
  0x51   :  { %v1163_v54 = vpack.c.bf16 %v496_v50, %v494_v49  ;;  %v1165_v55 = vpack.c.bf16 %v495_v52, %v493_v51  ;;  %v498_v56 = vld [vmem:[#allocation6 + $0x28] sm:$0xff]  ;;  %v500_v57 = vld [vmem:[#allocation6 + $0x38] sm:$0xff]  ;;  %v359_v59 = vld [vmem:[#allocation4 + $0x140] sm:$0xff] }
  0x52   :  { %1094 = vmatpush3.bf16.msra.mxu0 %v1093_v23  ;;  %1126 = vmatpush1.bf16.msra.mxu1 %v1125_v24  ;;  %v1167_v60 = vpack.c.bf16 %v500_v57, %v498_v56  ;;  %v497_v61 = vld [vmem:[#allocation6 + $0x20] sm:$0xff]  ;;  %v499_v62 = vld [vmem:[#allocation6 + $0x30] sm:$0xff]  ;;  %v502_v1 = vld [vmem:[#allocation6 + $0x48] sm:$0xff] }
  0x53   :  { %1096 = vmatprep.subr.bf16.mxu0 %v1095_v25  ;;  %1128 = vmatprep.subr.bf16.mxu1 %v1127_v28  ;;  %v361_v0 = vld [vmem:[#allocation4 + $0x150] sm:$0xff]  ;;  %v504_v2 = vld [vmem:[#allocation6 + $0x58] sm:$0xff]  ;;  %v364_v3 = vld [vmem:[#allocation4 + $0x168] sm:$0xff]  ;;  %v1169_v7 = vpack.c.bf16 %v499_v62, %v497_v61 }
  0x54   :  { %v366_v4 = vld [vmem:[#allocation4 + $0x178] sm:$0xff]  ;;  %v1578_v5 = vld [vmem:[#allocation2 + $0x20] sm:$0xff]  ;;  %v1141_v8 = vpack.c.bf16 %v361_v0, %v359_v59  ;;  %v1171_v10 = vpack.c.bf16 %v504_v2, %v502_v1  ;;  %v503_v12 = vld [vmem:[#allocation6 + $0x50] sm:$0xff] }
  0x55   :  { %v1580_v6 = vld [vmem:[#allocation2 + $0x38] sm:$0xff]  ;;  %v363_v9 = vld [vmem:[#allocation4 + $0x160] sm:$0xff]  ;;  %v1143_v13 = vpack.c.bf16 %v366_v4, %v364_v3  ;;  %v365_v14 = vld [vmem:[#allocation4 + $0x170] sm:$0xff] }
  0x56   :  { %1098 = vmatpush3.bf16.msra.mxu0 %v1097_v33  ;;  %1130 = vmatpush1.bf16.msra.mxu1 %v1129_v34  ;;  %v501_v11 = vld [vmem:[#allocation6 + $0x40] sm:$0xff]  ;;  %v506_v15 = vld [vmem:[#allocation6 + $0x68] sm:$0xff]  ;;  %v508_v16 = vld [vmem:[#allocation6 + $0x78] sm:$0xff]  ;;  %v1145_v21 = vpack.c.bf16 %v365_v14, %v363_v9 }
  0x57   :  { %1132 = vmatprep.subr.bf16.mxu1 %v1131_v35  ;;  %1164 = vmatprep.subr.bf16.mxu0 %v1163_v54  ;;  %v368_v17 = vld [vmem:[#allocation4 + $0x188] sm:$0xff]  ;;  %v370_v18 = vld [vmem:[#allocation4 + $0x198] sm:$0xff]  ;;  %v1584_v19 = vld [vmem:[#allocation2 + $0x30] sm:$0xff]  ;;  %v1173_v20 = vpack.c.bf16 %v503_v12, %v501_v11  ;;  %v1175_v23 = vpack.c.bf16 %v508_v16, %v506_v15 }
  0x58   :  { %v367_v22 = vld [vmem:[#allocation4 + $0x180] sm:$0xff]  ;;  %v507_v25 = vld [vmem:[#allocation6 + $0x70] sm:$0xff]  ;;  %v1147_v26 = vpack.c.bf16 %v370_v18, %v368_v17  ;;  %v510_v28 = vld [vmem:[#allocation6 + $0x88] sm:$0xff] }
  0x59   :  { %180 = vmatmul.mubr.f32.vlgmr.msra.gmra.mrb[0].mxu0 %v1566_v40  ;;  %v505_v24 = vld [vmem:[#allocation6 + $0x60] sm:$0xff]  ;;  %v369_v27 = vld [vmem:[#allocation4 + $0x190] sm:$0xff]  ;;  %v512_v29 = vld [vmem:[#allocation6 + $0x98] sm:$0xff] }
  0x5a   :  { %184 = vmatprep.mubr.f32.mxu0 %v1568_v42  ;;  %1134 = vmatpush1.bf16.msra.mxu1 %v1133_v41  ;;  %v372_v30 = vld [vmem:[#allocation4 + $0x1a8] sm:$0xff]  ;;  %v374_v31 = vld [vmem:[#allocation4 + $0x1b8] sm:$0xff]  ;;  %v1177_v32 = vpack.c.bf16 %v507_v25, %v505_v24  ;;  %v1149_v33 = vpack.c.bf16 %v369_v27, %v367_v22  ;;  %v371_v34 = vld [vmem:[#allocation4 + $0x1a0] sm:$0xff]  ;;  %v1179_v35 = vpack.c.bf16 %v512_v29, %v510_v28 }
  0x5b   :  { %1136 = vmatprep.subr.bf16.mxu1 %v1135_v46  ;;  %1166 = vmatpush1.bf16.msra.mxu0 %v1165_v55  ;;  %v509_v36 = vld [vmem:[#allocation6 + $0x80] sm:$0xff]  ;;  %v511_v37 = vld [vmem:[#allocation6 + $0x90] sm:$0xff]  ;;  %v1151_v38 = vpack.c.bf16 %v374_v31, %v372_v30  ;;  %v514_v41 = vld [vmem:[#allocation6 + $0xa8] sm:$0xff] }
  0x5c   :  { %1168 = vmatprep.subr.bf16.mxu0 %v1167_v60  ;;  %v373_v39 = vld [vmem:[#allocation4 + $0x1b0] sm:$0xff]  ;;  %v516_v43 = vld [vmem:[#allocation6 + $0xb8] sm:$0xff]  ;;  %v376_v44 = vld [vmem:[#allocation4 + $0x1c8] sm:$0xff]  ;;  %v1181_v47 = vpack.c.bf16 %v511_v37, %v509_v36 }
  0x5d   :  { %185 = vmatmul.mubr.f32.gmra.mrb[2].mxu0 %v1570_v45  ;;  %v378_v46 = vld [vmem:[#allocation4 + $0x1d8] sm:$0xff]  ;;  %v1153_v48 = vpack.c.bf16 %v373_v39, %v371_v34  ;;  %v375_v49 = vld [vmem:[#allocation4 + $0x1c0] sm:$0xff]  ;;  %v1183_v50 = vpack.c.bf16 %v516_v43, %v514_v41  ;;  %v515_v52 = vld [vmem:[#allocation6 + $0xb0] sm:$0xff] }
  0x5e   :  { %189 = vmatprep.mubr.f32.mxu0 %v1574_v53  ;;  %1138 = vmatpush1.bf16.msra.mxu1 %v1137_v58  ;;  %v513_v51 = vld [vmem:[#allocation6 + $0xa0] sm:$0xff]  ;;  %v1155_v54 = vpack.c.bf16 %v378_v46, %v376_v44  ;;  %v377_v55 = vld [vmem:[#allocation4 + $0x1d0] sm:$0xff]  ;;  %v518_v56 = vld [vmem:[#allocation6 + $0xc8] sm:$0xff] }
  0x5f   :  { %1140 = vmatprep.subr.bf16.mxu1 %v1139_v63  ;;  %1170 = vmatpush1.bf16.msra.mxu0 %v1169_v7  ;;  %v520_v57 = vld [vmem:[#allocation6 + $0xd8] sm:$0xff]  ;;  %v380_v58 = vld [vmem:[#allocation4 + $0x1e8] sm:$0xff]  ;;  %v1185_v60 = vpack.c.bf16 %v515_v52, %v513_v51  ;;  %v1157_v61 = vpack.c.bf16 %v377_v55, %v375_v49  ;;  %v379_v0 = vld [vmem:[#allocation4 + $0x1e0] sm:$0xff] }
  0x60   :  { %1172 = vmatprep.subr.bf16.mxu0 %v1171_v10  ;;  %v382_v59 = vld [vmem:[#allocation4 + $0x1f8] sm:$0xff]  ;;  %v1187_v62 = vpack.c.bf16 %v520_v57, %v518_v56  ;;  %v381_v1 = vld [vmem:[#allocation4 + $0x1f0] sm:$0xff]  ;;  %v517_v3 = vld [vmem:[#allocation6 + $0xc0] sm:$0xff] }
  0x61   :  { %190 = vmatmul.mubr.f32.gmra.mrb[4].mxu0 %v1578_v5  ;;  %v1159_v63 = vpack.c.bf16 %v382_v59, %v380_v58  ;;  %v1161_v2 = vpack.c.bf16 %v381_v1, %v379_v0  ;;  %v519_v4 = vld [vmem:[#allocation6 + $0xd0] sm:$0xff]  ;;  %v524_v9 = vld [vmem:[#allocation6 + $0xf8] sm:$0xff]  ;;  %v530_v14 = vld [vmem:[#allocation6 + $0x128] sm:$0xff] }
  0x62   :  { %194 = vmatprep.mubr.f32.mxu0 %v1580_v6  ;;  %1142 = vmatpush1.bf16.msra.mxu1 %v1141_v8  ;;  %v1189_v7 = vpack.c.bf16 %v519_v4, %v517_v3  ;;  %v522_v8 = vld [vmem:[#allocation6 + $0xe8] sm:$0xff]  ;;  %v523_v11 = vld [vmem:[#allocation6 + $0xf0] sm:$0xff]  ;;  %v532_v15 = vld [vmem:[#allocation6 + $0x138] sm:$0xff] }
  0x63   :  { %1144 = vmatprep.subr.bf16.mxu1 %v1143_v13  ;;  %1174 = vmatpush1.bf16.msra.mxu0 %v1173_v20  ;;  %v1191_v10 = vpack.c.bf16 %v524_v9, %v522_v8  ;;  %v527_v13 = vld [vmem:[#allocation6 + $0x110] sm:$0xff]  ;;  %v1199_v16 = vpack.c.bf16 %v532_v15, %v530_v14  ;;  %v529_v17 = vld [vmem:[#allocation6 + $0x120] sm:$0xff]  ;;  %v534_v20 = vld [vmem:[#allocation6 + $0x148] sm:$0xff] }
  0x64   :  { %1176 = vmatprep.subr.bf16.mxu0 %v1175_v23  ;;  %v531_v18 = vld [vmem:[#allocation6 + $0x130] sm:$0xff]  ;;  %v533_v23 = vld [vmem:[#allocation6 + $0x140] sm:$0xff]  ;;  %v540_v27 = vld [vmem:[#allocation6 + $0x178] sm:$0xff] }
  0x65   :  { %195 = vmatmul.mubr.f32.gmra.mrb[6].mxu0 %v1584_v19  ;;  %v535_v24 = vld [vmem:[#allocation6 + $0x150] sm:$0xff]  ;;  %v537_v29 = vld [vmem:[#allocation6 + $0x160] sm:$0xff]  ;;  %v542_v31 = vld [vmem:[#allocation6 + $0x188] sm:$0xff] }
  0x66   :  { %1146 = vmatpush1.bf16.msra.mxu1 %v1145_v21  ;;  %v536_v21 = vld [vmem:[#allocation6 + $0x158] sm:$0xff]  ;;  %v1205_v25 = vpack.c.bf16 %v535_v24, %v533_v23  ;;  %v539_v30 = vld [vmem:[#allocation6 + $0x170] sm:$0xff]  ;;  %v541_v34 = vld [vmem:[#allocation6 + $0x180] sm:$0xff] }
  0x67   :  { %1148 = vmatprep.subr.bf16.mxu1 %v1147_v26  ;;  %1178 = vmatpush1.bf16.msra.mxu0 %v1177_v32  ;;  %v1203_v22 = vpack.c.bf16 %v536_v21, %v534_v20  ;;  %v538_v26 = vld [vmem:[#allocation6 + $0x168] sm:$0xff]  ;;  %v1209_v32 = vpack.c.bf16 %v539_v30, %v537_v29  ;;  %v545_v43 = vld [vmem:[#allocation6 + $0x1a0] sm:$0xff]  ;;  %v547_v44 = vld [vmem:[#allocation6 + $0x1b0] sm:$0xff] }
  0x68   :  { %1180 = vmatprep.subr.bf16.mxu0 %v1179_v35  ;;  %v1207_v28 = vpack.c.bf16 %v540_v27, %v538_v26  ;;  %v543_v35 = vld [vmem:[#allocation6 + $0x190] sm:$0xff]  ;;  %v546_v37 = vld [vmem:[#allocation6 + $0x1a8] sm:$0xff]  ;;  %v556_v55 = vld [vmem:[#allocation6 + $0x1f8] sm:$0xff] }
  0x69   :  { %v1213_v39 = vpack.c.bf16 %v543_v35, %v541_v34  ;;  %v550_v46 = vld [vmem:[#allocation6 + $0x1c8] sm:$0xff]  ;;  %v551_v51 = vld [vmem:[#allocation6 + $0x1d0] sm:$0xff]  ;;  %v553_v57 = vld [vmem:[#allocation6 + $0x1e0] sm:$0xff] }
  0x6a   :  { %1150 = vmatpush1.bf16.msra.mxu1 %v1149_v33  ;;  %v544_v33 = vld [vmem:[#allocation6 + $0x198] sm:$0xff]  ;;  %v555_v58 = vld [vmem:[#allocation6 + $0x1f0] sm:$0xff] }
  0x6b   :  { %1152 = vmatprep.subr.bf16.mxu1 %v1151_v38  ;;  %1182 = vmatpush1.bf16.msra.mxu0 %v1181_v47  ;;  %v1211_v36 = vpack.c.bf16 %v544_v33, %v542_v31  ;;  %v548_v38 = vld [vmem:[#allocation6 + $0x1b8] sm:$0xff]  ;;  %v1225_v59 = vpack.c.bf16 %v555_v58, %v553_v57 }
  0x6c   :  { %1184 = vmatprep.subr.bf16.mxu0 %v1183_v50  ;;  %v1215_v41 = vpack.c.bf16 %v548_v38, %v546_v37  ;;  %v552_v47 = vld [vmem:[#allocation6 + $0x1d8] sm:$0xff]  ;;  %v549_v50 = vld [vmem:[#allocation6 + $0x1c0] sm:$0xff] }
  0x6d   :  { %v1219_v49 = vpack.c.bf16 %v552_v47, %v550_v46  ;;  %v1221_v52 = vpack.c.bf16 %v551_v51, %v549_v50  ;;  %v683_v38 = vld [vmem:[%s1844_s4 + $0x80] sm:$0xff]  ;;  %v668_v46 = vld [vmem:[%s1844_s4 + $0x8] sm:$0xff]  ;;  %v685_v47 = vld [vmem:[%s1844_s4 + $0x90] sm:$0xff] }
  0x6e   :  { %1154 = vmatpush1.bf16.msra.mxu1 %v1153_v48  ;;  %v1217_v48 = vpack.c.bf16 %v547_v44, %v545_v43 }
  0x6f   :  { %1156 = vmatprep.subr.bf16.mxu1 %v1155_v54  ;;  %1186 = vmatpush1.bf16.msra.mxu0 %v1185_v60  ;;  %v554_v54 = vld [vmem:[#allocation6 + $0x1e8] sm:$0xff] }
  0x70   :  { %1188 = vmatprep.subr.bf16.mxu0 %v1187_v62  ;;  %v1223_v56 = vpack.c.bf16 %v556_v55, %v554_v54  ;;  %v953_v62 = vld [vmem:[%s1845_s5] ss:$0 sm:$0xff]  ;;  %v670_v54 = vld [vmem:[%s1844_s4 + $0x18] sm:$0xff] }
  0x71   :  { %v687_v55 = vld [vmem:[%s1844_s4 + $0xa0] sm:$0xff] }
  0x72   :  { %1158 = vmatpush1.bf16.msra.mxu1 %v1157_v61 }
  0x73   :  { %1160 = vmatprep.subr.bf16.mxu1 %v1159_v63  ;;  %1190 = vmatpush1.bf16.msra.mxu0 %v1189_v7 }
  0x74   :  { %1192 = vmatprep.subr.bf16.mxu0 %v1191_v10 }
  0x76   :  { %1162 = vmatpush1.bf16.msra.mxu1 %v1161_v2 }
  0x79   :  { %461 = vmatmul.mubr.f32.vlgmr.msra.gmra.mrb[0].mxu1 %v1566_v40  ;;  %v521_v40 = vld [vmem:[#allocation6 + $0xe0] sm:$0xff] }
  0x7a   :  { %466 = vmatprep.mubr.f32.mxu1 %v1568_v42  ;;  %v1193_v42 = vpack.c.bf16 %v523_v11, %v521_v40 }
  0x7c   :  { %1194 = vmatpush1.bf16.msra.mxu0 %v1193_v42 }
  0x7d   :  { %467 = vmatmul.mubr.f32.gmra.mrb[2].mxu1 %v1570_v45  ;;  %v526_v45 = vld [vmem:[#allocation6 + $0x108] sm:$0xff] }
  0x7e   :  { %472 = vmatprep.mubr.f32.mxu1 %v1574_v53  ;;  %v528_v53 = vld [vmem:[#allocation6 + $0x118] sm:$0xff] }
  0x7f   :  { %v1195_v12 = vpack.c.bf16 %v528_v53, %v526_v45  ;;  %v236_v53 = vlaneseq }
  0x81   :  { %473 = vmatmul.mubr.f32.gmra.mrb[4].mxu1 %v1578_v5  ;;  %v525_v5 = vld [vmem:[#allocation6 + $0x100] sm:$0xff]  ;;  %1196 = vmatprep.subr.bf16.mxu0 %v1195_v12  ;;  %v1610_v12 = vshrl.u32 %v236_v53, 7 }
  0x82   :  { %478 = vmatprep.mubr.f32.mxu1 %v1580_v6  ;;  %v1197_v6 = vpack.c.bf16 %v527_v13, %v525_v5  ;;  %v954_v13 = vld [vmem:[%s1845_s5 + $0x1] ss:$4 sm:$0x3] }
  0x83   :  { %v388_v5 = vsub.s32 0, %v1610_v12 }
  0x84   :  { %1198 = vmatpush1.bf16.msra.mxu0 %v1197_v6  ;;  %v392_v6 = vsub.s32 1, %v1610_v12 }
  0x85   :  { %479 = vmatmul.mubr.f32.gmra.mrb[6].mxu1 %v1584_v19  ;;  %v1201_v19 = vpack.c.bf16 %v531_v18, %v529_v17  ;;  %1200 = vmatprep.subr.bf16.mxu0 %v1199_v16  ;;  %v389_v14 = vrot.slane %v954_v13, %v388_v5 }
  0x86   :  { %v393_v15 = vrot.slane %v954_v13, %v392_v6  ;;  %v693_v13 = vld [vmem:[%s1844_s4 + $0xd0] sm:$0xff] }
  0x88   :  { %1202 = vmatpush1.bf16.msra.mxu0 %v1201_v19 }
  0x89   :  { %1204 = vmatprep.subr.bf16.mxu0 %v1203_v22 }
  0x8c   :  { %1206 = vmatpush1.bf16.msra.mxu0 %v1205_v25 }
  0x8d   :  { %1208 = vmatprep.subr.bf16.mxu0 %v1207_v28 }
  0x90   :  { %1210 = vmatpush1.bf16.msra.mxu0 %v1209_v32 }
  0x91   :  { %1212 = vmatprep.subr.bf16.mxu0 %v1211_v36 }
  0x94   :  { %1214 = vmatpush1.bf16.msra.mxu0 %v1213_v39  ;;  %v684_v39 = vld [vmem:[%s1844_s4 + $0x88] sm:$0xff] }
  0x95   :  { %1216 = vmatprep.subr.bf16.mxu0 %v1215_v41  ;;  %v667_v41 = vld [vmem:[%s1844_s4] sm:$0xff]  ;;  %v1227_v44 = vpack.c.bf16 %v684_v39, %v683_v38 }
  0x96   :  { %v1229_v50 = vpack.c.bf16 %v668_v46, %v667_v41 }
  0x97   :  { %1228 = vmatprep.subr.bf16.mxu1 %v1227_v44 }
  0x98   :  { %1218 = vmatpush1.bf16.msra.mxu0 %v1217_v48  ;;  %v686_v48 = vld [vmem:[%s1844_s4 + $0x98] sm:$0xff]  ;;  %1230 = vmatpush3.bf16.msra.mxu1 %v1229_v50 }
  0x99   :  { %1220 = vmatprep.subr.bf16.mxu0 %v1219_v49  ;;  %v1231_v51 = vpack.c.bf16 %v686_v48, %v685_v47 }
  0x9b   :  { %1232 = vmatprep.subr.bf16.mxu1 %v1231_v51 }
  0x9c   :  { %1222 = vmatpush1.bf16.msra.mxu0 %v1221_v52  ;;  %v669_v52 = vld [vmem:[%s1844_s4 + $0x10] sm:$0xff] }
  0x9d   :  { %1224 = vmatprep.subr.bf16.mxu0 %v1223_v56  ;;  %v688_v56 = vld [vmem:[%s1844_s4 + $0xa8] sm:$0xff]  ;;  %v1233_v57 = vpack.c.bf16 %v670_v54, %v669_v52 }
  0x9e   :  { %v1235_v58 = vpack.c.bf16 %v688_v56, %v687_v55 }
  0x9f   :  { %1234 = vmatpush3.bf16.msra.mxu1 %v1233_v57 }
  0xa0   :  { %1226 = vmatpush1.bf16.msra.mxu0 %v1225_v59  ;;  %v671_v59 = vld [vmem:[%s1844_s4 + $0x20] sm:$0xff]  ;;  %1236 = vmatprep.subr.bf16.mxu1 %v1235_v58 }
 0x12c   :  { %v998_v60 = vpop.f32.mrb[0].mxu0 }
 0x12d   :  { %v999_v61 = vpop.f32.mrb[1].mxu0 }
 0x12e   :  { %v1000_v63 = vadd.f32 %v999_v61, %v998_v60  ;;  %v672_v60 = vld [vmem:[%s1844_s4 + $0x28] sm:$0xff]  ;;  %v689_v61 = vld [vmem:[%s1844_s4 + $0xb0] sm:$0xff] }
 0x130   :  { %v1001_v0 = vpop.f32.mrb[2].mxu0  ;;  %v1597_v1 = vadd.f32 %v1000_v63, %v953_v62  ;;  %v1237_v63 = vpack.c.bf16 %v672_v60, %v671_v59 }
 0x131   :  { %v1002_v2 = vpop.f32.mrb[3].mxu0 }
 0x132   :  { %v1003_v3 = vadd.f32 %v1002_v2, %v1001_v0  ;;  %200 = vmax.xlane.f32.xlu0 %v1597_v1  ;;  %v673_v2 = vld [vmem:[%s1844_s4 + $0x30] sm:$0xff]  ;;  %1238 = vmatpush3.bf16.msra.mxu1 %v1237_v63 }
 0x134   :  { %v1004_v4 = vpop.f32.mrb[4].mxu0  ;;  %v1600_v7 = vadd.f32 %v1003_v3, %v953_v62  ;;  %v674_v3 = vld [vmem:[%s1844_s4 + $0x38] sm:$0xff] }
 0x135   :  { %v1005_v8 = vpop.f32.mrb[5].mxu0 }
 0x136   :  { %v1006_v9 = vadd.f32 %v1005_v8, %v1004_v4  ;;  %202 = vmax.xlane.f32.xlu0 %v1600_v7  ;;  %v691_v4 = vld [vmem:[%s1844_s4 + $0xc0] sm:$0xff]  ;;  %v692_v8 = vld [vmem:[%s1844_s4 + $0xc8] sm:$0xff] }
 0x138   :  { %v1007_v10 = vpop.f32.mrb[6].mxu0  ;;  %v1603_v40 = vadd.f32 %v1006_v9, %v953_v62  ;;  %v1241_v9 = vpack.c.bf16 %v674_v3, %v673_v2 }
 0x139   :  { %v1008_v11 = vpop.f32.mrb[7].mxu0 }
 0x13a   :  { %v1009_v42 = vadd.f32 %v1008_v11, %v1007_v10  ;;  %204 = vmax.xlane.f32.xlu1 %v1603_v40  ;;  %v1243_v10 = vpack.c.bf16 %v692_v8, %v691_v4  ;;  %v675_v11 = vld [vmem:[%s1844_s4 + $0x40] sm:$0xff] }
 0x13c   :  { %v1606_v45 = vadd.f32 %v1009_v42, %v953_v62  ;;  %v690_v62 = vld [vmem:[%s1844_s4 + $0xb8] sm:$0xff]  ;;  %v676_v42 = vld [vmem:[%s1844_s4 + $0x48] sm:$0xff] }
 0x13d   :  { %v1239_v0 = vpack.c.bf16 %v690_v62, %v689_v61 }
 0x13e   :  { %206 = vmax.xlane.f32.xlu1 %v1606_v45 }
 0x13f   :  { %1240 = vmatprep.subr.bf16.mxu1 %v1239_v0 }
 0x140   :  { %1242 = vmatpush3.bf16.msra.mxu1 %v1241_v9 }
 0x141   :  { %1244 = vmatprep.subr.bf16.mxu1 %v1243_v10 }
 0x14c   :  { %v462_v16 = vpop.f32.mrb[0].mxu1 }
 0x14d   :  { %v463_v17 = vadd.f32 %v462_v16, %v389_v14  ;;  %v464_v18 = vpop.f32.mrb[1].mxu1 }
 0x14e   :  { %v465_v19 = vadd.f32 %v464_v18, %v393_v15  ;;  %v678_v18 = vld [vmem:[%s1844_s4 + $0x58] sm:$0xff] }
 0x14f   :  { %v485_v20 = vmax.f32 %v463_v17, 0.0  ;;  %v677_v17 = vld [vmem:[%s1844_s4 + $0x50] sm:$0xff] }
 0x150   :  { %v486_v21 = vmax.f32 %v465_v19, 0.0  ;;  %v468_v22 = vpop.f32.mrb[2].mxu1  ;;  %v695_v19 = vld [vmem:[%s1844_s4 + $0xe0] sm:$0xff] }
 0x151   :  { %v469_v23 = vadd.f32 %v468_v22, %v389_v14  ;;  %v470_v24 = vpop.f32.mrb[3].mxu1 }
 0x152   :  { %v471_v25 = vadd.f32 %v470_v24, %v393_v15  ;;  %634 = vmatprep.mubr.f32.mxu0 %v486_v21  ;;  %v1249_v21 = vpack.c.bf16 %v678_v18, %v677_v17  ;;  %v680_v24 = vld [vmem:[%s1844_s4 + $0x68] sm:$0xff] }
 0x153   :  { %v487_v26 = vmax.f32 %v469_v23, 0.0  ;;  %635 = vmatmul.mubr.f32.vlgmr.msra.gmra.mrb[8].mxu0 %v485_v20  ;;  %v696_v20 = vld [vmem:[%s1844_s4 + $0xe8] sm:$0xff]  ;;  %v679_v23 = vld [vmem:[%s1844_s4 + $0x60] sm:$0xff] }
 0x154   :  { %v488_v27 = vmax.f32 %v471_v25, 0.0  ;;  %v474_v28 = vpop.f32.mrb[4].mxu1  ;;  %v1251_v22 = vpack.c.bf16 %v696_v20, %v695_v19  ;;  %v1253_v25 = vpack.c.bf16 %v680_v24, %v679_v23 }
 0x155   :  { %v475_v29 = vadd.f32 %v474_v28, %v389_v14  ;;  %v476_v30 = vpop.f32.mrb[5].mxu1 }
 0x156   :  { %v477_v31 = vadd.f32 %v476_v30, %v393_v15  ;;  %640 = vmatprep.mubr.f32.mxu0 %v488_v27  ;;  %v698_v27 = vld [vmem:[%s1844_s4 + $0xf8] sm:$0xff] }
 0x157   :  { %v489_v32 = vmax.f32 %v475_v29, 0.0  ;;  %641 = vmatmul.mubr.f32.gmra.mrb[10].mxu0 %v487_v26  ;;  %v697_v26 = vld [vmem:[%s1844_s4 + $0xf0] sm:$0xff]  ;;  %v682_v30 = vld [vmem:[%s1844_s4 + $0x78] sm:$0xff] }
 0x158   :  { %v490_v33 = vmax.f32 %v477_v31, 0.0  ;;  %v480_v34 = vpop.f32.mrb[6].mxu1  ;;  %v1255_v28 = vpack.c.bf16 %v698_v27, %v697_v26  ;;  %v681_v29 = vld [vmem:[%s1844_s4 + $0x70] sm:$0xff] }
 0x159   :  { %v481_v35 = vadd.f32 %v480_v34, %v389_v14  ;;  %v482_v36 = vpop.f32.mrb[7].mxu1  ;;  %v694_v14 = vld [vmem:[%s1844_s4 + $0xd8] sm:$0xff]  ;;  %v1257_v31 = vpack.c.bf16 %v682_v30, %v681_v29 }
 0x15a   :  { %v483_v37 = vadd.f32 %v482_v36, %v393_v15  ;;  %646 = vmatprep.mubr.f32.mxu0 %v490_v33  ;;  %v1245_v15 = vpack.c.bf16 %v676_v42, %v675_v11  ;;  %v1247_v16 = vpack.c.bf16 %v694_v14, %v693_v13  ;;  %v1729_v14 = vand.u32 127, %v236_v53 }
 0x15b   :  { %v491_v43 = vmax.f32 %v481_v35, 0.0  ;;  %647 = vmatmul.mubr.f32.gmra.mrb[12].mxu0 %v489_v32 }
 0x15c   :  { %v492_v49 = vmax.f32 %v483_v37, 0.0  ;;  %1246 = vmatpush3.bf16.msra.mxu1 %v1245_v15  ;;  %vm238_vm0 = vcmp.lt.s32.totalorder %v1729_v14, 12  ;;  %vm924_vm11 = vcmp.eq.s32.totalorder %v1729_v14, 0  ;;  %vm933_vm12 = vcmp.eq.s32.totalorder %v1729_v14, 1 }
 0x15d   :  { %1248 = vmatprep.subr.bf16.mxu1 %v1247_v16 }
 0x15e   :  { %652 = vmatprep.mubr.f32.mxu0 %v492_v49 }
 0x15f   :  { %653 = vmatmul.mubr.f32.gmra.mrb[14].mxu0 %v491_v43 }
 0x160   :  { %1250 = vmatpush3.bf16.msra.mxu1 %v1249_v21 }
 0x161   :  { %1252 = vmatprep.subr.bf16.mxu1 %v1251_v22 }
 0x164   :  { %1254 = vmatpush3.bf16.msra.mxu1 %v1253_v25 }
 0x165   :  { %1256 = vmatprep.subr.bf16.mxu1 %v1255_v28  ;;  %v813_v28 = vld [vmem:[%s1846_s6] sm:$0xf] }
 0x166   :  { %1059 = vmatprep.subr.msk.mxu0 %vm827_vm1, %v813_v28 }
 0x167   :  { %1060 = vmatpush3.msk.msra.mxu0 %vm827_vm1, %v813_v28 }
 0x168   :  { %1258 = vmatpush3.bf16.msra.mxu1 %v1257_v31 }
 0x169   :  { %1259 = vmatprep.subr.msk.mxu1 %vm827_vm1, %v813_v28 }
 0x1bf   :  { %v201_v32 = vpop.xlane.xlu0 %200 }
 0x1c0   :  { %v208_v33 = vsub.f32 %v1597_v1, %v201_v32 }
 0x1c2   :  { %v212_v34 = vmul.f32 1.442695, %v208_v33 }
 0x1c3   :  { %v203_v35 = vpop.xlane.xlu0 %202 }
 0x1c4   :  { %1266 = vpow2.f32 %v212_v34  ;;  %v209_v36 = vsub.f32 %v1600_v7, %v203_v35  ;;  %v955_v7 = vld [vmem:[%s1845_s5 + $0x2] ss:$4 sm:$0x3] }
 0x1c6   :  { %v214_v37 = vmul.f32 1.442695, %v209_v36 }
 0x1c7   :  { %v205_v38 = vpop.xlane.xlu1 %204 }
 0x1c8   :  { %1268 = vpow2.f32 %v214_v37  ;;  %v210_v39 = vsub.f32 %v1603_v40, %v205_v38  ;;  %v563_v40 = vrot.slane %v955_v7, %v388_v5 }
 0x1ca   :  { %v216_v41 = vmul.f32 1.442695, %v210_v39 }
 0x1cb   :  { %v207_v43 = vpop.xlane.xlu1 %206 }
 0x1cc   :  { %1270 = vpow2.f32 %v216_v41  ;;  %v211_v44 = vsub.f32 %v1606_v45, %v207_v43  ;;  %v567_v45 = vrot.slane %v955_v7, %v392_v6  ;;  %v956_v41 = vld [vmem:[%s1845_s5 + $0x3] ss:$0 sm:$0xff] }
 0x1ce   :  { %v1267_v46 = vpop.eup %1266  ;;  %v218_v47 = vmul.f32 1.442695, %v211_v44 }
 0x1cf   :  { %220 = vadd.xlane.f32.xlu0 %v1267_v46 }
 0x1d0   :  { %1272 = vpow2.f32 %v218_v47 }
 0x1d2   :  { %v1269_v1 = vpop.eup %1268 }
 0x1d3   :  { %222 = vadd.xlane.f32.xlu1 %v1269_v1 }
 0x1d6   :  { %v1271_v48 = vpop.eup %1270 }
 0x1d7   :  { %224 = vadd.xlane.f32.xlu0 %v1271_v48 }
 0x1da   :  { %v1273_v49 = vpop.eup %1272 }
 0x1db   :  { %226 = vadd.xlane.f32.xlu1 %v1273_v49 }
 0x226   :  { %v636_v50 = vpop.f32.mrb[8].mxu0 }
 0x227   :  { %v637_v51 = vadd.f32 %v636_v50, %v563_v40  ;;  %v638_v52 = vpop.f32.mrb[9].mxu0 }
 0x228   :  { %v639_v54 = vadd.f32 %v638_v52, %v567_v45 }
 0x229   :  { %v659_v55 = vmax.f32 %v637_v51, 0.0 }
 0x22a   :  { %v660_v56 = vmax.f32 %v639_v54, 0.0  ;;  %v642_v57 = vpop.f32.mrb[10].mxu0 }
 0x22b   :  { %v643_v58 = vadd.f32 %v642_v57, %v563_v40  ;;  %v644_v59 = vpop.f32.mrb[11].mxu0 }
 0x22c   :  { %v645_v60 = vadd.f32 %v644_v59, %v567_v45  ;;  %768 = vmatprep.mubr.f32.mxu1 %v660_v56 }
 0x22d   :  { %v661_v61 = vmax.f32 %v643_v58, 0.0  ;;  %769 = vmatmul.mubr.f32.vlgmr.msra.gmra.mrb[8].mxu1 %v659_v55 }
 0x22e   :  { %v662_v62 = vmax.f32 %v645_v60, 0.0  ;;  %v648_v63 = vpop.f32.mrb[12].mxu0  ;;  %1260 = vmatpush3.msk.msra.mxu1 %vm827_vm1, %v813_v28 }
 0x22f   :  { %v649_v0 = vadd.f32 %v648_v63, %v563_v40  ;;  %v650_v5 = vpop.f32.mrb[13].mxu0 }
 0x230   :  { %v651_v2 = vadd.f32 %v650_v5, %v567_v45  ;;  %773 = vmatprep.mubr.f32.mxu1 %v662_v62 }
 0x231   :  { %v663_v12 = vmax.f32 %v649_v0, 0.0  ;;  %774 = vmatmul.mubr.f32.gmra.mrb[10].mxu1 %v661_v61 }
 0x232   :  { %v664_v6 = vmax.f32 %v651_v2, 0.0  ;;  %v654_v3 = vpop.f32.mrb[14].mxu0 }
 0x233   :  { %v655_v4 = vadd.f32 %v654_v3, %v563_v40  ;;  %v656_v8 = vpop.f32.mrb[15].mxu0 }
 0x234   :  { %v657_v9 = vadd.f32 %v656_v8, %v567_v45  ;;  %778 = vmatprep.mubr.f32.mxu1 %v664_v6 }
 0x235   :  { %v665_v10 = vmax.f32 %v655_v4, 0.0  ;;  %779 = vmatmul.mubr.f32.gmra.mrb[12].mxu1 %v663_v12 }
 0x236   :  { %v666_v11 = vmax.f32 %v657_v9, 0.0 }
 0x238   :  { %783 = vmatprep.mubr.f32.mxu1 %v666_v11 }
 0x239   :  { %784 = vmatmul.mubr.f32.gmra.mrb[14].mxu1 %v665_v10 }
 0x25c   :  { %v221_v42 = vpop.xlane.xlu0 %220 }
 0x25d   :  { %1274 = vrcp.f32 %v221_v42 }
 0x260   :  { %v223_v13 = vpop.xlane.xlu1 %222 }
 0x261   :  { %1276 = vrcp.f32 %v223_v13 }
 0x264   :  { %v225_v15 = vpop.xlane.xlu0 %224 }
 0x265   :  { %1278 = vrcp.f32 %v225_v15 }
 0x267   :  { %v1275_v16 = vpop.eup %1274 }
 0x268   :  { %v227_v17 = vpop.xlane.xlu1 %226  ;;  %v229_v18 = vmul.f32 %v1275_v16, %v1267_v46 }
 0x269   :  { %1280 = vrcp.f32 %v227_v17 }
 0x26a   :  { %v239_v19 = vsel %vm238_vm0, %v229_v18, -1.0 }
 0x26b   :  { %v1277_v20 = vpop.eup %1276  ;;  %243 = vmax.xlane.f32.xlu0 %v239_v19 }
 0x26c   :  { %v231_v21 = vmul.f32 %v1277_v20, %v1269_v1 }
 0x26e   :  { %v240_v22 = vsel %vm238_vm0, %v231_v21, -1.0 }
 0x26f   :  { %v1279_v23 = vpop.eup %1278  ;;  %245 = vmax.xlane.f32.xlu1 %v240_v22 }
 0x270   :  { %v233_v53 = vmul.f32 %v1279_v23, %v1271_v48 }
 0x272   :  { %v241_v24 = vsel %vm238_vm0, %v233_v53, -1.0 }
 0x273   :  { %v1281_v25 = vpop.eup %1280  ;;  %247 = vmax.xlane.f32.xlu0 %v241_v24 }
 0x274   :  { %v235_v26 = vmul.f32 %v1281_v25, %v1273_v49 }
 0x276   :  { %v242_v27 = vsel %vm238_vm0, %v235_v26, -1.0 }
 0x277   :  { %249 = vmax.xlane.f32.xlu1 %v242_v27 }
 0x2f8   :  { %v1743_v29 = vpop.xlane.xlu0 %243 }
 0x2f9   :  { %vm251_vm2 = vcmp.ge.f32.partialorder %v239_v19, %v1743_v29 }
 0x2fa   :  { %v1747_v30 = vsel %vm251_vm2, %v1729_v14, 1073741824 }
 0x2fb   :  { %v260_v31 = vshra.s32 %v1747_v30, 16  ;;  %v259_v16 = vand.u32 65535, %v1747_v30 }
 0x2fc   :  { %v1750_v32 = vpop.xlane.xlu1 %245 }
 0x2fd   :  { %vm252_vm3 = vcmp.ge.f32.partialorder %v240_v22, %v1750_v32  ;;  %v1753_v33 = vcvt.s32.f32 %v260_v31  ;;  %v261_v18 = vcvt.s32.f32 %v259_v16 }
 0x2fe   :  { %v1756_v34 = vsel %vm252_vm3, %v1729_v14, 1073741824 }
 0x2ff   :  { %263 = vmin.xlane.f32.xlu0 %v1753_v33  ;;  %v274_v35 = vshra.s32 %v1756_v34, 16  ;;  %v273_v19 = vand.u32 65535, %v1756_v34  ;;  %v916_v34 = vld [vmem:[%s1847_s7] sm:$0xff] }
 0x300   :  { %v1760_v36 = vpop.xlane.xlu0 %247  ;;  %v1042_v37 = vpop.f32.mrb[8].mxu1 }
 0x301   :  { %vm253_vm4 = vcmp.ge.f32.partialorder %v241_v24, %v1760_v36  ;;  %v1763_v38 = vcvt.s32.f32 %v274_v35  ;;  %v1043_v43 = vpop.f32.mrb[9].mxu1  ;;  %v275_v22 = vcvt.s32.f32 %v273_v19 }
 0x302   :  { %v1766_v39 = vsel %vm253_vm4, %v1729_v14, 1073741824  ;;  %v1044_v44 = vadd.f32 %v1043_v43, %v1042_v37  ;;  %v925_v43 = vsel %vm924_vm11, %v1743_v29, 0.0  ;;  %v918_v29 = vld [vmem:[%s1847_s7 + $0x10] sm:$0xff] }
 0x303   :  { %277 = vmin.xlane.f32.xlu1 %v1763_v38  ;;  %v288_v46 = vshra.s32 %v1766_v39, 16  ;;  %v287_v23 = vand.u32 65535, %v1766_v39  ;;  %v926_v39 = vsel %vm924_vm11, %v1750_v32, 0.0 }
 0x304   :  { %v1773_v47 = vpop.xlane.xlu1 %249  ;;  %v771_v1 = vadd.f32 %v1044_v44, %v956_v41  ;;  %v1045_v48 = vpop.f32.mrb[10].mxu1 }
 0x305   :  { %vm254_vm5 = vcmp.ge.f32.partialorder %v242_v27, %v1773_v47  ;;  %v1776_v49 = vcvt.s32.f32 %v288_v46  ;;  %v1046_v40 = vpop.f32.mrb[11].mxu1  ;;  %v289_v25 = vcvt.s32.f32 %v287_v23 }
 0x306   :  { %v1779_v7 = vsel %vm254_vm5, %v1729_v14, 1073741824  ;;  %v957_v45 = vmul.f32 -1.442695, %v771_v1  ;;  %v1047_v50 = vadd.f32 %v1046_v40, %v1045_v48 }
 0x307   :  { %291 = vmin.xlane.f32.xlu0 %v1776_v49  ;;  %v302_v51 = vshra.s32 %v1779_v7, 16  ;;  %v301_v26 = vand.u32 65535, %v1779_v7 }
 0x308   :  { %1282 = vpow2.f32 %v957_v45  ;;  %v776_v52 = vadd.f32 %v1047_v50, %v956_v41  ;;  %v1048_v54 = vpop.f32.mrb[12].mxu1 }
 0x309   :  { %v304_v55 = vcvt.s32.f32 %v302_v51  ;;  %v1049_v56 = vpop.f32.mrb[13].mxu1  ;;  %v303_v30 = vcvt.s32.f32 %v301_v26 }
 0x30a   :  { %v958_v57 = vmul.f32 -1.442695, %v776_v52  ;;  %v1050_v58 = vadd.f32 %v1049_v56, %v1048_v54 }
 0x30b   :  { %305 = vmin.xlane.f32.xlu1 %v304_v55 }
 0x30c   :  { %1284 = vpow2.f32 %v958_v57  ;;  %v781_v59 = vadd.f32 %v1050_v58, %v956_v41  ;;  %v1051_v60 = vpop.f32.mrb[14].mxu1 }
 0x30d   :  { %v1052_v61 = vpop.f32.mrb[15].mxu1 }
 0x30e   :  { %v959_v62 = vmul.f32 -1.442695, %v781_v59  ;;  %v1053_v63 = vadd.f32 %v1052_v61, %v1051_v60 }
 0x310   :  { %1286 = vpow2.f32 %v959_v62  ;;  %v786_v0 = vadd.f32 %v1053_v63, %v956_v41 }
 0x312   :  { %v1283_v5 = vpop.eup %1282  ;;  %v960_v2 = vmul.f32 -1.442695, %v786_v0 }
 0x313   :  { %v801_v12 = vadd.f32 1.0, %v1283_v5 }
 0x314   :  { %1288 = vpow2.f32 %v960_v2  ;;  %v919_v2 = vld [vmem:[%s1847_s7 + $0x18] sm:$0xff] }
 0x315   :  { %1290 = vrcp.f32 %v801_v12 }
 0x316   :  { %v1285_v6 = vpop.eup %1284 }
 0x317   :  { %v802_v3 = vadd.f32 1.0, %v1285_v6 }
 0x319   :  { %1292 = vrcp.f32 %v802_v3 }
 0x31a   :  { %v1287_v4 = vpop.eup %1286 }
 0x31b   :  { %v803_v8 = vadd.f32 1.0, %v1287_v4 }
 0x31d   :  { %1294 = vrcp.f32 %v803_v8  ;;  %v927_v8 = vsel %vm924_vm11, %v1760_v36, 0.0 }
 0x31e   :  { %v1289_v9 = vpop.eup %1288 }
 0x31f   :  { %v1291_v10 = vpop.eup %1290  ;;  %v804_v11 = vadd.f32 1.0, %v1289_v9 }
 0x320   :  { %1061 = vmatprep.mubr.msk.f32.mxu0 %vm814_vm6, %v1291_v10 }
 0x321   :  { %1296 = vrcp.f32 %v804_v11 }
 0x323   :  { %v1293_v42 = vpop.eup %1292 }
 0x324   :  { %1062 = vmatmul.mubr.msk.f32.vlgmr.msra.gmra.mrb[16].mxu0 %vm814_vm6, %v1293_v42 }
 0x327   :  { %v1295_v13 = vpop.eup %1294 }
 0x328   :  { %1064 = vmatprep.mubr.msk.f32.mxu1 %vm814_vm6, %v1295_v13 }
 0x32b   :  { %v1297_v15 = vpop.eup %1296 }
 0x32c   :  { %1065 = vmatmul.mubr.msk.f32.vlgmr.msra.gmra.mrb[16].mxu1 %vm814_vm6, %v1297_v15 }
 0x38c   :  { %v264_v17 = vpop.xlane.xlu0 %263 }
 0x38d   :  { %vm265_vm7 = vcmp.eq.f32.partialorder %v1753_v33, %v264_v17  ;;  %v917_v33 = vld [vmem:[%s1847_s7 + $0x8] sm:$0xff] }
 0x38e   :  { %v266_v20 = vsel %vm265_vm7, %v261_v18, inf  ;;  %v928_v18 = vsel %vm924_vm11, %v1773_v47, 0.0 }
 0x38f   :  { %267 = vmin.xlane.f32.xlu0 %v266_v20 }
 0x390   :  { %v278_v21 = vpop.xlane.xlu1 %277 }
 0x391   :  { %vm279_vm8 = vcmp.eq.f32.partialorder %v1763_v38, %v278_v21  ;;  %v284_v45 = vcvt.f32.s32 %v278_v21 }
 0x392   :  { %v280_v53 = vsel %vm279_vm8, %v275_v22, inf }
 0x393   :  { %281 = vmin.xlane.f32.xlu1 %v280_v53  ;;  %v285_v54 = vshll.u32 %v284_v45, 16 }
 0x394   :  { %v292_v24 = vpop.xlane.xlu0 %291 }
 0x395   :  { %vm293_vm9 = vcmp.eq.f32.partialorder %v1776_v49, %v292_v24  ;;  %v270_v49 = vcvt.f32.s32 %v264_v17  ;;  %v298_v32 = vcvt.f32.s32 %v292_v24 }
 0x396   :  { %v294_v27 = vsel %vm293_vm9, %v289_v25, inf }
 0x397   :  { %295 = vmin.xlane.f32.xlu0 %v294_v27  ;;  %v271_v40 = vshll.u32 %v270_v49, 16  ;;  %v299_v61 = vshll.u32 %v298_v32, 16 }
 0x398   :  { %v306_v28 = vpop.xlane.xlu1 %305 }
 0x399   :  { %vm307_vm10 = vcmp.eq.f32.partialorder %v304_v55, %v306_v28  ;;  %v312_v62 = vcvt.f32.s32 %v306_v28 }
 0x39a   :  { %v308_v31 = vsel %vm307_vm10, %v303_v30, inf }
 0x39b   :  { %309 = vmin.xlane.f32.xlu1 %v308_v31  ;;  %v313_v9 = vshll.u32 %v312_v62, 16 }
 0x3f7   :  { %v1063_v35 = vpop.f32.mrb[16].mxu0 }
 0x3f8   :  { %v921_v37 = vmul.f32 %v1063_v35, %v917_v33  ;;  %v897_v38 = vpop.f32.mrb[17].mxu0 }
 0x3f9   :  { %v920_v41 = vmul.f32 %v916_v34, %v897_v38 }
 0x3fa   :  { %v930_v44 = vadd.f32 %v926_v39, %v921_v37 }
 0x3fb   :  { %v929_v46 = vadd.f32 %v925_v43, %v920_v41 }
 0x3ff   :  { %v1066_v1 = vpop.f32.mrb[16].mxu1 }
 0x400   :  { %v907_v48 = vpop.f32.mrb[17].mxu1  ;;  %v923_v42 = vmul.f32 %v1066_v1, %v919_v2 }
 0x401   :  { %v922_v5 = vmul.f32 %v918_v29, %v907_v48 }
 0x402   :  { %v932_v19 = vadd.f32 %v928_v18, %v923_v42 }
 0x403   :  { %v931_v13 = vadd.f32 %v927_v8, %v922_v5 }
 0x41c   :  { %v268_v7 = vpop.xlane.xlu0 %267 }
 0x41d   :  { %v269_v50 = vcvt.f32.s32 %v268_v7 }
 0x41f   :  { %v272_v51 = vadd.s32 %v271_v40, %v269_v50 }
 0x420   :  { %v282_v52 = vpop.xlane.xlu1 %281 }
 0x421   :  { %v315_v55 = vcvt.s32.f32 %v272_v51  ;;  %v283_v56 = vcvt.f32.s32 %v282_v52 }
 0x423   :  { %v934_v57 = vsel %vm933_vm12, %v315_v55, 0.0  ;;  %v286_v58 = vadd.s32 %v285_v54, %v283_v56 }
 0x424   :  { %v938_v59 = vadd.f32 %v934_v57, %v929_v46  ;;  %v296_v60 = vpop.xlane.xlu0 %295 }
 0x425   :  { %v316_v63 = vcvt.s32.f32 %v286_v58  ;;  %v297_v0 = vcvt.f32.s32 %v296_v60 }
 0x426   :  { %943 = vst.msk [vmem:[%s1848_s8] sm:$0xff] %vm942_vm13, %v938_v59 }
 0x427   :  { %v935_v12 = vsel %vm933_vm12, %v316_v63, 0.0  ;;  %v300_v6 = vadd.s32 %v299_v61, %v297_v0 }
 0x428   :  { %v939_v3 = vadd.f32 %v935_v12, %v930_v44  ;;  %v310_v4 = vpop.xlane.xlu1 %309 }
 0x429   :  { %v317_v10 = vcvt.s32.f32 %v300_v6  ;;  %v311_v11 = vcvt.f32.s32 %v310_v4 }
 0x42a   :  { %944 = vst.msk [vmem:[%s1848_s8 + $0x8] sm:$0xff] %vm942_vm13, %v939_v3 }
 0x42b   :  { %v936_v15 = vsel %vm933_vm12, %v317_v10, 0.0  ;;  %v314_v16 = vadd.s32 %v313_v9, %v311_v11 }
 0x42c   :  { %v940_v17 = vadd.f32 %v936_v15, %v931_v13 }
 0x42d   :  { %v318_v36 = vcvt.s32.f32 %v314_v16 }
 0x42e   :  { %945 = vst.msk [vmem:[%s1848_s8 + $0x10] sm:$0xff] %vm942_vm13, %v940_v17 }
 0x42f   :  { %v937_v20 = vsel %vm933_vm12, %v318_v36, 0.0 }
 0x430   :  { %v941_v21 = vadd.f32 %v937_v20, %v932_v19 }
 0x432   :  { %946 = vst.msk [vmem:[%s1848_s8 + $0x18] sm:$0xff] %vm942_vm13, %v941_v21 }
 0x433   :  { %951 = vsyncpa [#allocation3], 1 }
 0x434   :  { %952 = vsyncpa [#allocation5], 1 }

</bundles_post_ra>
